<compile_context>
chip_gen: v6e
topology: v6e:2x2x1
jax: 0.10.0
libtpu: 0.0.40
codegen_flags: <defaults>
</compile_context>

<pallas_src>
import jax
import jax.numpy as jnp
from jax import lax
from jax.experimental import pallas as pl
from jax.experimental.pallas import tpu as pltpu

F32 = jnp.float32
BF16 = jnp.bfloat16
LANE = 128
TRANS3_COUT = 1025          # fixed by the module spec
_TIME_TILE_TARGET = 512     # output rows per grid step (multiple of 8)
_LHALO = 2                  # left halo rows in the activation scratch


def _round_up(n, m):
    return (n + m - 1) // m * m


# ---------------------------------------------------------------------------
# In-kernel helpers (channels-last (time, chan) values).
# ---------------------------------------------------------------------------
def _prep(x, relu=False):
    """Fused (optional) ReLU + bf16 cast, applied before any pad/concat."""
    if relu:
        x = jnp.maximum(x, 0.0)
    return x.astype(BF16)


def _pad_rows(xb, lo, hi):
    """Zero-pad along time (sublane axis); operand is already bf16."""
    c = xb.shape[1]
    parts = []
    if lo:
        parts.append(jnp.zeros((lo, c), xb.dtype))
    parts.append(xb)
    if hi:
        parts.append(jnp.zeros((hi, c), xb.dtype))
    return jnp.concatenate(parts, axis=0) if len(parts) > 1 else xb


def _corr3(xb, w2d, bias=None):
    """K=3 valid cross-correlation on an already padded/windowed bf16 input.

    xb  : (T, C) bf16
    w2d : (3*C, Cout) bf16, taps stacked k-major
    returns (T-2, Cout) f32

    C >= 128 : 3 shifted per-tap matmuls (no lane-concat relayout).
    small C  : one im2col matmul (3C contraction fills the MXU better).
    """
    t, c = xb.shape
    n = t - 2
    if c >= 128:
        acc = jnp.dot(xb[0:n], w2d[0:c], preferred_element_type=F32)
        acc = acc + jnp.dot(xb[1:n + 1], w2d[c:2 * c],
                            preferred_element_type=F32)
        acc = acc + jnp.dot(xb[2:n + 2], w2d[2 * c:3 * c],
                            preferred_element_type=F32)
    else:
        a = jnp.concatenate([xb[0:n], xb[1:n + 1], xb[2:n + 2]], axis=1)
        acc = jnp.dot(a, w2d, preferred_element_type=F32)
    if bias is not None:
        acc = acc + bias
    return acc


# ---------------------------------------------------------------------------
# Kernel: grid = (batch, time_tile).
# ---------------------------------------------------------------------------
def _decoder_kernel(spk_ref, x_ref, w1_ref, b1_ref, wr3_ref, wr1_ref,
                    wt1_ref, bt1_ref, wt2_ref, bt2_ref, wt3_ref, bt3_ref,
                    o_ref, up_ref, xr_ref):
    L = x_ref.shape[1]
    TWO_L = up_ref.shape[0]          # = 2 * L
    TO = o_ref.shape[1]              # output rows per tile (multiple of 8)
    n_res = wr3_ref.shape[0]
    i = pl.program_id(1)

    # ---- phase 1 (first time-tile of each batch element): conv1 + upsample
    # + residual stack over the whole sequence; ReLU'd result stashed (bf16)
    # in a persistent VMEM scratch with zero halo rows.
    @pl.when(i == 0)
    def _():
        x = x_ref[0]                                    # (L, Cin) f32
        spk = spk_ref[0]                                # (3, H)  f32

        # conv1 on the audio channels only; the time-constant speaker
        # contribution is an additive bias (rows 0 / L-1 lose the tap that
        # falls on the zero pad).
        h = _corr3(_pad_rows(_prep(x), 1, 1), w1_ref[...], bias=b1_ref[...])
        row = lax.broadcasted_iota(jnp.int32, (L, 1), 0)
        h = (h + spk[0:1, :]
             - jnp.where(row == 0, spk[1:2, :], 0.0)
             - jnp.where(row == L - 1, spk[2:3, :], 0.0))      # (L, H) f32

        # nearest-neighbour 2x upsample as an O(L*H) interleave:
        # write h into the even and odd sublanes with two stride-2 stores.
        up_ref[pl.ds(0, L, 2), :] = h
        up_ref[pl.ds(1, L, 2), :] = h
        xa = up_ref[...]                                # (2L, H) f32

        # residual stack (bias-free convs); static python loop is fine for
        # small n_res (switch to lax.fori_loop over the stacked weights for
        # deep stacks).
        for l in range(n_res):
            hid = _corr3(_pad_rows(_prep(xa, relu=True), 1, 1), wr3_ref[l])
            xa = xa + jnp.dot(_prep(hid, relu=True), wr1_ref[l],
                              preferred_element_type=F32)

        # final stack ReLU folded into the stash; zero halos once.
        xr_ref[...] = jnp.zeros(xr_ref.shape, xr_ref.dtype)
        xr_ref[pl.ds(_LHALO, TWO_L), :] = _prep(xa, relu=True)

    # ---- phase 2 (every time-tile): the 3 transposed convs on a haloed
    # window; only the (TO, cpad) output block is VMEM-resident, so the big
    # lane-dense writeback DMA pipelines under the next tile's compute.
    r0 = pl.multiple_of(i * TO, 8)
    # scratch rows [r0, r0+TO+6) == global rows [r0-2, r0+TO+4)
    xw = xr_ref[pl.ds(r0, TO + 6), :]

    # _conv_trans_1 (k=3, p=1) -> y1 at global rows [r0-1, r0+TO+3)
    y1 = _corr3(xw, wt1_ref[...], bias=bt1_ref[...])
    gy1 = r0 - 1 + lax.broadcasted_iota(jnp.int32, (TO + 4, 1), 0)
    y1 = jnp.where((gy1 >= 0) & (gy1 < TWO_L), jnp.maximum(y1, 0.0), 0.0)

    # _conv_trans_2 (k=3, p=0) -> y2 at global rows [r0+1, r0+TO+3), + ReLU
    y2 = jnp.maximum(_corr3(y1.astype(BF16), wt2_ref[...],
                            bias=bt2_ref[...]), 0.0)

    # _conv_trans_3 (k=3, p=3) -> output rows [r0, r0+TO)
    out = _corr3(y2.astype(BF16), wt3_ref[...], bias=bt3_ref[...])
    o_ref[0] = out.astype(o_ref.dtype)


# ---------------------------------------------------------------------------
# Wrapper.
# ---------------------------------------------------------------------------
def _w_spec(a):
    nd = a.ndim
    return pl.BlockSpec(a.shape, lambda b, i, _n=nd: (0,) * _n)


def _vmem_limit_bytes():
    # Raise the scoped-VMEM limit above the 16/32 MiB defaults, leaving
    # headroom (~56 MiB on 64-MiB parts, capped at 100 MiB elsewhere).
    try:
        cap = int(getattr(pltpu.get_tpu_info(), "vmem_capacity_bytes", 0))
        if cap <= 0:
            cap = 64 * 1024 * 1024
    except Exception:
        cap = 64 * 1024 * 1024
    return int(min(cap - 8 * 1024 * 1024, 100 * 1024 * 1024))


@jax.jit
def _decoder_apply(params, inputs_ncw, idx):
    B, Cin, L = inputs_ncw.shape
    H = params["conv1_b"].shape[1]
    cpad = params["trans3_w"].shape[1]                  # 1152 (lane-padded)
    lout = 2 * L - 2

    # speaker embedding folded into conv1's bias: per-batch rows
    # [sum of spk taps, tap k=0, tap k=2] -- tiny, exact (f32).
    spk_emb = jnp.take(params["embedding"], idx, axis=0)        # (B, E)
    s = jnp.einsum("be,keh->bkh", spk_emb, params["conv1_wspk"],
                   precision=lax.Precision.HIGHEST)             # (B, 3, H)
    spk_terms = jnp.stack([s[:, 0] + s[:, 1] + s[:, 2], s[:, 0], s[:, 2]],
                          axis=1)                               # (B, 3, H)

    x = jnp.transpose(inputs_ncw, (0, 2, 1)).astype(F32)        # (B, L, Cin)

    # time tiling of the output / transposed convs.
    TO = min(_TIME_TILE_TARGET, _round_up(lout, 8))
    n_t = (lout + TO - 1) // TO
    lout_pad = n_t * TO
    nrows = _round_up(max(2 * L + _LHALO, lout_pad + 6), 8)

    weights = (params["conv1_w"], params["conv1_b"],
               params["res_w3"], params["res_w1"],
               params["trans1_w"], params["trans1_b"],
               params["trans2_w"], params["trans2_b"],
               params["trans3_w"], params["trans3_b"])

    out = pl.pallas_call(
        _decoder_kernel,
        out_shape=jax.ShapeDtypeStruct((B, lout_pad, cpad), F32),
        grid=(B, n_t),
        in_specs=[pl.BlockSpec((1, 3, H), lambda b, i: (b, 0, 0)),
                  pl.BlockSpec((1, L, Cin), lambda b, i: (b, 0, 0))]
                 + [_w_spec(w) for w in weights],
        out_specs=pl.BlockSpec((1, TO, cpad), lambda b, i: (b, i, 0)),
        scratch_shapes=[pltpu.VMEM((2 * L, H), F32),      # upsample interleave
                        pltpu.VMEM((nrows, H), BF16)],    # stashed activations
        compiler_params=pltpu.CompilerParams(
            dimension_semantics=("parallel", "arbitrary"),
            vmem_limit_bytes=_vmem_limit_bytes()),
    )(spk_terms, x, *weights)

    # crop the lane / time padding and return NCW like the PyTorch module.
    return jnp.transpose(out[:, :lout, :TRANS3_COUT], (0, 2, 1))


def decoder_forward(params, inputs_ncw, speaker_dic, speaker_id):
    # host-side python dict lookup, mirrors
    # torch.tensor([speaker_dic[str(int(i))] for i in speaker_id])
    idx = jnp.array([speaker_dic[str(int(i))] for i in speaker_id],
                    dtype=jnp.int32)
    return _decoder_apply(params, inputs_ncw, idx)


# ---------------------------------------------------------------------------
# Deterministic parameter initialization (PyTorch module shapes), stored
# pre-transformed into the kernel's correlation / im2col layouts.
# ---------------------------------------------------------------------------
def _uniform(key, shape, fan_in):
    bound = 1.0 / float(fan_in) ** 0.5
    return jax.random.uniform(key, shape, F32, -bound, bound)


def init_decoder_params(key, in_channels, num_hiddens, num_residual_layers,
                        num_residual_hiddens, num_speakers,
                        speaker_embedding_dim):
    keys = jax.random.split(key, 9 + 2 * num_residual_layers)
    ki = iter(keys)
    E, H, R, Cin = (speaker_embedding_dim, num_hiddens,
                    num_residual_hiddens, in_channels)
    c1 = Cin + E
    p = {}

    # nn.Embedding(len(speaker_dic), speaker_embedding_dim)
    p["embedding"] = jax.random.normal(next(ki), (num_speakers, E), F32)

    # nn.Conv1d weight (H, Cin+E, 3); channel order of the module's concat is
    # [speaker embedding, inputs].  Speaker part kept f32 (3, E, H) and folded
    # into the bias in the wrapper; audio part in im2col layout (3*Cin, H).
    w = _uniform(next(ki), (H, c1, 3), c1 * 3)
    wc = jnp.transpose(w, (2, 1, 0))                       # (3, c1, H)
    p["conv1_wspk"] = wc[:, :E, :]                         # (3, E, H) f32
    p["conv1_w"] = wc[:, E:, :].reshape(3 * Cin, H).astype(BF16)
    p["conv1_b"] = _uniform(next(ki), (H,), c1 * 3).reshape(1, H)

    # ResidualStack conv weights (bias=False), stacked over layers.
    w3s, w1s = [], []
    for _ in range(num_residual_layers):
        w3 = _uniform(next(ki), (R, H, 3), H * 3)
        w1 = _uniform(next(ki), (H, R, 1), R)
        w3s.append(jnp.transpose(w3, (2, 1, 0)).reshape(3 * H, R))
        w1s.append(jnp.transpose(w1, (2, 1, 0)).reshape(R, H))
    p["res_w3"] = jnp.stack(w3s).astype(BF16)              # (n_res, 3H, R)
    p["res_w1"] = jnp.stack(w1s).astype(BF16)              # (n_res, R, H)

    # ConvTranspose1d (stride=1) weight (Cin, Cout, K): equivalent correlation
    # weight corr[k, ci, co] = w[ci, co, K-1-k], time pad K-1-p.
    def t_corr_2d(wt):
        k = wt.shape[2]
        return jnp.transpose(wt[:, :, ::-1], (2, 0, 1)).reshape(
            k * wt.shape[0], wt.shape[1])

    wt1 = _uniform(next(ki), (H, H, 3), H * 3)
    p["trans1_w"] = t_corr_2d(wt1).astype(BF16)            # (3H, H)
    p["trans1_b"] = _uniform(next(ki), (H,), H * 3).reshape(1, H)

    wt2 = _uniform(next(ki), (H, H, 3), H * 3)
    p["trans2_w"] = t_corr_2d(wt2).astype(BF16)
    p["trans2_b"] = _uniform(next(ki), (H,), H * 3).reshape(1, H)

    # last layer: Cout padded 1025 -> 1152 (9*128) so the only HBM store is
    # lane-dense; the wrapper crops the padding back off.
    cpad = _round_up(TRANS3_COUT, LANE)
    wt3 = _uniform(next(ki), (H, TRANS3_COUT, 3), H * 3)
    p["trans3_w"] = jnp.pad(t_corr_2d(wt3),
                            ((0, 0), (0, cpad - TRANS3_COUT))).astype(BF16)
    b3 = _uniform(next(ki), (TRANS3_COUT,), H * 3)
    p["trans3_b"] = jnp.pad(b3, (0, cpad - TRANS3_COUT)).reshape(1, cpad)
    return p


if __name__ == "__main__":
    in_channels = 8
    num_hiddens = 32
    num_residual_layers = 2
    num_residual_hiddens = 16
    speaker_embedding_dim = 8
    speaker_dic = {"0": 0, "1": 1, "2": 2, "3": 3}
    B, L = 2, 16

    key = jax.random.PRNGKey(0)
    k_in, k_par = jax.random.split(key)
    inputs = jax.random.normal(k_in, (B, in_channels, L), F32)
    speaker_id = [0, 2]

    params = init_decoder_params(
        k_par, in_channels, num_hiddens, num_residual_layers,
        num_residual_hiddens, len(speaker_dic), speaker_embedding_dim)

    out = decoder_forward(params, inputs, speaker_dic, speaker_id)
    out = jax.block_until_ready(out)

    # L=16 -> conv1:16 -> upsample:32 -> trans1:32 -> trans2:34 -> trans3:30
    assert out.shape == (B, 1025, 2 * L - 2), out.shape
    assert out.dtype == jnp.float32
    print("KERNEL_OK")
</pallas_src>

<mosaic_0001>
module attributes {stable_mosaic.version = 11 : i64} {
  func.func @_decoder_kernel(%arg0: i32, %arg1: i32, %arg2: memref<1x3x32xf32, #tpu.memory_space<vmem>>, %arg3: memref<1x16x8xf32, #tpu.memory_space<vmem>>, %arg4: memref<24x32xbf16, #tpu.memory_space<vmem>>, %arg5: memref<1x32xf32, #tpu.memory_space<vmem>>, %arg6: memref<2x96x16xbf16, #tpu.memory_space<vmem>>, %arg7: memref<2x16x32xbf16, #tpu.memory_space<vmem>>, %arg8: memref<96x32xbf16, #tpu.memory_space<vmem>>, %arg9: memref<1x32xf32, #tpu.memory_space<vmem>>, %arg10: memref<96x32xbf16, #tpu.memory_space<vmem>>, %arg11: memref<1x32xf32, #tpu.memory_space<vmem>>, %arg12: memref<96x1152xbf16, #tpu.memory_space<vmem>>, %arg13: memref<1x1152xf32, #tpu.memory_space<vmem>>, %arg14: memref<1x32x1152xf32, #tpu.memory_space<vmem>>, %arg15: memref<32x32xf32, #tpu.memory_space<vmem>>, %arg16: memref<40x32xbf16, #tpu.memory_space<vmem>>) attributes {dimension_semantics = [#tpu.dimension_semantics<parallel>, #tpu.dimension_semantics<arbitrary>], iteration_bounds = array<i64: 2, 1>, scalar_prefetch = 0 : i64, scratch_operands = 2 : i64, tpu.core_type = #tpu.core_type<tc>, window_params = [{transform_indices = @transform_0, window_bounds = array<i64: 1, 3, 32>}, {transform_indices = @transform_1, window_bounds = array<i64: 1, 16, 8>}, {pipeline_mode = #tpu.pipeline_mode<synchronous>, transform_indices = @transform_2, window_bounds = array<i64: 24, 32>}, {pipeline_mode = #tpu.pipeline_mode<synchronous>, transform_indices = @transform_3, window_bounds = array<i64: 1, 32>}, {pipeline_mode = #tpu.pipeline_mode<synchronous>, transform_indices = @transform_4, window_bounds = array<i64: 2, 96, 16>}, {pipeline_mode = #tpu.pipeline_mode<synchronous>, transform_indices = @transform_5, window_bounds = array<i64: 2, 16, 32>}, {pipeline_mode = #tpu.pipeline_mode<synchronous>, transform_indices = @transform_6, window_bounds = array<i64: 96, 32>}, {pipeline_mode = #tpu.pipeline_mode<synchronous>, transform_indices = @transform_7, window_bounds = array<i64: 1, 32>}, {pipeline_mode = #tpu.pipeline_mode<synchronous>, transform_indices = @transform_8, window_bounds = array<i64: 96, 32>}, {pipeline_mode = #tpu.pipeline_mode<synchronous>, transform_indices = @transform_9, window_bounds = array<i64: 1, 32>}, {pipeline_mode = #tpu.pipeline_mode<synchronous>, transform_indices = @transform_10, window_bounds = array<i64: 96, 1152>}, {pipeline_mode = #tpu.pipeline_mode<synchronous>, transform_indices = @transform_11, window_bounds = array<i64: 1, 1152>}, {transform_indices = @transform_12, window_bounds = array<i64: 1, 32, 1152>}]} {
    %c0_i32 = arith.constant 0 : i32
    %0 = arith.cmpi eq, %arg1, %c0_i32 : i32
    %1 = arith.extui %0 : i1 to i32
    %c0_i32_0 = arith.constant 0 : i32
    %2 = arith.cmpi ne, %1, %c0_i32_0 : i32
    scf.if %2 {
      %c0_23 = arith.constant 0 : index
      %c0_24 = arith.constant 0 : index
      %c0_25 = arith.constant 0 : index
      %56 = vector.load %arg3[%c0_23, %c0_24, %c0_25] : memref<1x16x8xf32, #tpu.memory_space<vmem>>, vector<1x16x8xf32>
      %57 = vector.shape_cast %56 : vector<1x16x8xf32> to vector<16x8xf32>
      %c0_26 = arith.constant 0 : index
      %c0_27 = arith.constant 0 : index
      %c0_28 = arith.constant 0 : index
      %58 = vector.load %arg2[%c0_26, %c0_27, %c0_28] : memref<1x3x32xf32, #tpu.memory_space<vmem>>, vector<1x3x32xf32>
      %59 = vector.shape_cast %58 : vector<1x3x32xf32> to vector<3x32xf32>
      %60 = arith.truncf %57 : vector<16x8xf32> to vector<16x8xbf16>
      %cst_29 = arith.constant 0.000000e+00 : bf16
      %61 = vector.broadcast %cst_29 : bf16 to vector<1x8xbf16>
      %cst_30 = arith.constant 0.000000e+00 : bf16
      %62 = vector.broadcast %cst_30 : bf16 to vector<1x8xbf16>
      %63 = tpu.concatenate %61, %60, %62 in 0 : vector<1x8xbf16>, vector<16x8xbf16>, vector<1x8xbf16> -> vector<18x8xbf16>
      %c0_31 = arith.constant 0 : index
      %c0_32 = arith.constant 0 : index
      %64 = vector.load %arg4[%c0_31, %c0_32] : memref<24x32xbf16, #tpu.memory_space<vmem>>, vector<24x32xbf16>
      %c0_33 = arith.constant 0 : index
      %c0_34 = arith.constant 0 : index
      %65 = vector.load %arg5[%c0_33, %c0_34] : memref<1x32xf32, #tpu.memory_space<vmem>>, vector<1x32xf32>
      %66 = vector.extract_strided_slice %63 {offsets = [0, 0], sizes = [16, 8], strides = [1, 1]} : vector<18x8xbf16> to vector<16x8xbf16>
      %67 = vector.extract_strided_slice %63 {offsets = [1, 0], sizes = [16, 8], strides = [1, 1]} : vector<18x8xbf16> to vector<16x8xbf16>
      %68 = vector.extract_strided_slice %63 {offsets = [2, 0], sizes = [16, 8], strides = [1, 1]} : vector<18x8xbf16> to vector<16x8xbf16>
      %69 = tpu.concatenate %66, %67, %68 in 1 : vector<16x8xbf16>, vector<16x8xbf16>, vector<16x8xbf16> -> vector<16x24xbf16>
      %cst_35 = arith.constant dense<0.000000e+00> : vector<16x32xf32>
      %70 = tpu.matmul %69, %64, %cst_35 {dimension_numbers = #tpu.dot_dimension_numbers<[1], [0], [0], [1], [0, 0, 1, 1], [], []>} : vector<16x24xbf16>, vector<24x32xbf16>, vector<16x32xf32> -> vector<16x32xf32>
      %71 = vector.broadcast %65 : vector<1x32xf32> to vector<16x32xf32>
      %72 = arith.addf %70, %71 : vector<16x32xf32>
      %73 = tpu.iota {dimensions = array<i32: 0>} : vector<16x1xi32>
      %74 = vector.extract_strided_slice %59 {offsets = [0, 0], sizes = [1, 32], strides = [1, 1]} : vector<3x32xf32> to vector<1x32xf32>
      %75 = vector.broadcast %74 : vector<1x32xf32> to vector<16x32xf32>
      %76 = arith.addf %72, %75 : vector<16x32xf32>
      %c0_i32_36 = arith.constant 0 : i32
      %77 = vector.broadcast %c0_i32_36 : i32 to vector<16x1xi32>
      %78 = arith.cmpi eq, %73, %77 : vector<16x1xi32>
      %79 = vector.extract_strided_slice %59 {offsets = [1, 0], sizes = [1, 32], strides = [1, 1]} : vector<3x32xf32> to vector<1x32xf32>
      %cst_37 = arith.constant 0.000000e+00 : f32
      %80 = vector.shape_cast %78 : vector<16x1xi1> to vector<16x1xi1>
      %81 = vector.broadcast %80 : vector<16x1xi1> to vector<16x32xi1>
      %82 = vector.shape_cast %79 : vector<1x32xf32> to vector<1x32xf32>
      %83 = vector.broadcast %82 : vector<1x32xf32> to vector<16x32xf32>
      %84 = vector.broadcast %cst_37 : f32 to vector<16x32xf32>
      %85 = arith.select %81, %83, %84 : vector<16x32xi1>, vector<16x32xf32>
      %86 = arith.subf %76, %85 : vector<16x32xf32>
      %c15_i32 = arith.constant 15 : i32
      %87 = vector.broadcast %c15_i32 : i32 to vector<16x1xi32>
      %88 = arith.cmpi eq, %73, %87 : vector<16x1xi32>
      %89 = vector.extract_strided_slice %59 {offsets = [2, 0], sizes = [1, 32], strides = [1, 1]} : vector<3x32xf32> to vector<1x32xf32>
      %cst_38 = arith.constant 0.000000e+00 : f32
      %90 = vector.shape_cast %88 : vector<16x1xi1> to vector<16x1xi1>
      %91 = vector.broadcast %90 : vector<16x1xi1> to vector<16x32xi1>
      %92 = vector.shape_cast %89 : vector<1x32xf32> to vector<1x32xf32>
      %93 = vector.broadcast %92 : vector<1x32xf32> to vector<16x32xf32>
      %94 = vector.broadcast %cst_38 : f32 to vector<16x32xf32>
      %95 = arith.select %91, %93, %94 : vector<16x32xi1>, vector<16x32xf32>
      %96 = arith.subf %86, %95 : vector<16x32xf32>
      %c0_39 = arith.constant 0 : index
      %c0_40 = arith.constant 0 : index
      %97 = tpu.strided_load %arg15[%c0_39, %c0_40] {strides = array<i32: 2, 1>} : memref<32x32xf32, #tpu.memory_space<vmem>>, vector<16x32xf32>
      tpu.strided_store %arg15[%c0_39, %c0_40], %96 {strides = array<i32: 2, 1>} : memref<32x32xf32, #tpu.memory_space<vmem>>, vector<16x32xf32>
      %c1 = arith.constant 1 : index
      %c0_41 = arith.constant 0 : index
      %98 = tpu.strided_load %arg15[%c1, %c0_41] {strides = array<i32: 2, 1>} : memref<32x32xf32, #tpu.memory_space<vmem>>, vector<16x32xf32>
      tpu.strided_store %arg15[%c1, %c0_41], %96 {strides = array<i32: 2, 1>} : memref<32x32xf32, #tpu.memory_space<vmem>>, vector<16x32xf32>
      %c0_42 = arith.constant 0 : index
      %c0_43 = arith.constant 0 : index
      %99 = vector.load %arg15[%c0_42, %c0_43] : memref<32x32xf32, #tpu.memory_space<vmem>>, vector<32x32xf32>
      %cst_44 = arith.constant 0.000000e+00 : f32
      %100 = vector.broadcast %cst_44 : f32 to vector<32x32xf32>
      %101 = arith.maximumf %99, %100 : vector<32x32xf32>
      %102 = arith.truncf %101 : vector<32x32xf32> to vector<32x32xbf16>
      %cst_45 = arith.constant 0.000000e+00 : bf16
      %103 = vector.broadcast %cst_45 : bf16 to vector<1x32xbf16>
      %cst_46 = arith.constant 0.000000e+00 : bf16
      %104 = vector.broadcast %cst_46 : bf16 to vector<1x32xbf16>
      %105 = tpu.concatenate %103, %102, %104 in 0 : vector<1x32xbf16>, vector<32x32xbf16>, vector<1x32xbf16> -> vector<34x32xbf16>
      %c0_47 = arith.constant 0 : index
      %c0_48 = arith.constant 0 : index
      %c0_49 = arith.constant 0 : index
      %106 = vector.load %arg6[%c0_47, %c0_48, %c0_49] : memref<2x96x16xbf16, #tpu.memory_space<vmem>>, vector<1x96x16xbf16>
      %107 = vector.shape_cast %106 : vector<1x96x16xbf16> to vector<96x16xbf16>
      %108 = vector.extract_strided_slice %105 {offsets = [0, 0], sizes = [32, 32], strides = [1, 1]} : vector<34x32xbf16> to vector<32x32xbf16>
      %109 = vector.extract_strided_slice %105 {offsets = [1, 0], sizes = [32, 32], strides = [1, 1]} : vector<34x32xbf16> to vector<32x32xbf16>
      %110 = vector.extract_strided_slice %105 {offsets = [2, 0], sizes = [32, 32], strides = [1, 1]} : vector<34x32xbf16> to vector<32x32xbf16>
      %111 = tpu.concatenate %108, %109, %110 in 1 : vector<32x32xbf16>, vector<32x32xbf16>, vector<32x32xbf16> -> vector<32x96xbf16>
      %cst_50 = arith.constant dense<0.000000e+00> : vector<32x16xf32>
      %112 = tpu.matmul %111, %107, %cst_50 {dimension_numbers = #tpu.dot_dimension_numbers<[1], [0], [0], [1], [0, 0, 1, 1], [], []>} : vector<32x96xbf16>, vector<96x16xbf16>, vector<32x16xf32> -> vector<32x16xf32>
      %cst_51 = arith.constant 0.000000e+00 : f32
      %113 = vector.broadcast %cst_51 : f32 to vector<32x16xf32>
      %114 = arith.maximumf %112, %113 : vector<32x16xf32>
      %115 = arith.truncf %114 : vector<32x16xf32> to vector<32x16xbf16>
      %c0_52 = arith.constant 0 : index
      %c0_53 = arith.constant 0 : index
      %c0_54 = arith.constant 0 : index
      %116 = vector.load %arg7[%c0_52, %c0_53, %c0_54] : memref<2x16x32xbf16, #tpu.memory_space<vmem>>, vector<1x16x32xbf16>
      %117 = vector.shape_cast %116 : vector<1x16x32xbf16> to vector<16x32xbf16>
      %cst_55 = arith.constant dense<0.000000e+00> : vector<32x32xf32>
      %118 = tpu.matmul %115, %117, %cst_55 {dimension_numbers = #tpu.dot_dimension_numbers<[1], [0], [0], [1], [0, 0, 1, 1], [], []>} : vector<32x16xbf16>, vector<16x32xbf16>, vector<32x32xf32> -> vector<32x32xf32>
      %119 = arith.addf %99, %118 : vector<32x32xf32>
      %cst_56 = arith.constant 0.000000e+00 : f32
      %120 = vector.broadcast %cst_56 : f32 to vector<32x32xf32>
      %121 = arith.maximumf %119, %120 : vector<32x32xf32>
      %122 = arith.truncf %121 : vector<32x32xf32> to vector<32x32xbf16>
      %cst_57 = arith.constant 0.000000e+00 : bf16
      %123 = vector.broadcast %cst_57 : bf16 to vector<1x32xbf16>
      %cst_58 = arith.constant 0.000000e+00 : bf16
      %124 = vector.broadcast %cst_58 : bf16 to vector<1x32xbf16>
      %125 = tpu.concatenate %123, %122, %124 in 0 : vector<1x32xbf16>, vector<32x32xbf16>, vector<1x32xbf16> -> vector<34x32xbf16>
      %c1_59 = arith.constant 1 : index
      %c0_60 = arith.constant 0 : index
      %c0_61 = arith.constant 0 : index
      %126 = vector.load %arg6[%c1_59, %c0_60, %c0_61] : memref<2x96x16xbf16, #tpu.memory_space<vmem>>, vector<1x96x16xbf16>
      %127 = vector.shape_cast %126 : vector<1x96x16xbf16> to vector<96x16xbf16>
      %128 = vector.extract_strided_slice %125 {offsets = [0, 0], sizes = [32, 32], strides = [1, 1]} : vector<34x32xbf16> to vector<32x32xbf16>
      %129 = vector.extract_strided_slice %125 {offsets = [1, 0], sizes = [32, 32], strides = [1, 1]} : vector<34x32xbf16> to vector<32x32xbf16>
      %130 = vector.extract_strided_slice %125 {offsets = [2, 0], sizes = [32, 32], strides = [1, 1]} : vector<34x32xbf16> to vector<32x32xbf16>
      %131 = tpu.concatenate %128, %129, %130 in 1 : vector<32x32xbf16>, vector<32x32xbf16>, vector<32x32xbf16> -> vector<32x96xbf16>
      %cst_62 = arith.constant dense<0.000000e+00> : vector<32x16xf32>
      %132 = tpu.matmul %131, %127, %cst_62 {dimension_numbers = #tpu.dot_dimension_numbers<[1], [0], [0], [1], [0, 0, 1, 1], [], []>} : vector<32x96xbf16>, vector<96x16xbf16>, vector<32x16xf32> -> vector<32x16xf32>
      %cst_63 = arith.constant 0.000000e+00 : f32
      %133 = vector.broadcast %cst_63 : f32 to vector<32x16xf32>
      %134 = arith.maximumf %132, %133 : vector<32x16xf32>
      %135 = arith.truncf %134 : vector<32x16xf32> to vector<32x16xbf16>
      %c1_64 = arith.constant 1 : index
      %c0_65 = arith.constant 0 : index
      %c0_66 = arith.constant 0 : index
      %136 = vector.load %arg7[%c1_64, %c0_65, %c0_66] : memref<2x16x32xbf16, #tpu.memory_space<vmem>>, vector<1x16x32xbf16>
      %137 = vector.shape_cast %136 : vector<1x16x32xbf16> to vector<16x32xbf16>
      %cst_67 = arith.constant dense<0.000000e+00> : vector<32x32xf32>
      %138 = tpu.matmul %135, %137, %cst_67 {dimension_numbers = #tpu.dot_dimension_numbers<[1], [0], [0], [1], [0, 0, 1, 1], [], []>} : vector<32x16xbf16>, vector<16x32xbf16>, vector<32x32xf32> -> vector<32x32xf32>
      %139 = arith.addf %119, %138 : vector<32x32xf32>
      %cst_68 = arith.constant 0.000000e+00 : bf16
      %140 = vector.broadcast %cst_68 : bf16 to vector<40x32xbf16>
      %c0_69 = arith.constant 0 : index
      %c0_70 = arith.constant 0 : index
      %141 = vector.load %arg16[%c0_69, %c0_70] : memref<40x32xbf16, #tpu.memory_space<vmem>>, vector<40x32xbf16>
      tpu.vector_store %arg16[%c0_69, %c0_70], %140 {strides = array<i32>} : memref<40x32xbf16, #tpu.memory_space<vmem>>, vector<40x32xbf16>,
      %cst_71 = arith.constant 0.000000e+00 : f32
      %142 = vector.broadcast %cst_71 : f32 to vector<32x32xf32>
      %143 = arith.maximumf %139, %142 : vector<32x32xf32>
      %144 = arith.truncf %143 : vector<32x32xf32> to vector<32x32xbf16>
      %c2 = arith.constant 2 : index
      %c0_72 = arith.constant 0 : index
      %145 = vector.load %arg16[%c2, %c0_72] : memref<40x32xbf16, #tpu.memory_space<vmem>>, vector<32x32xbf16>
      tpu.vector_store %arg16[%c2, %c0_72], %144 {strides = array<i32>} : memref<40x32xbf16, #tpu.memory_space<vmem>>, vector<32x32xbf16>,
    } else {
    }
    %c32_i32 = arith.constant 32 : i32
    %3 = arith.muli %arg1, %c32_i32 : i32
    %4 = tpu.assume_multiple %3, 8 : i32
    %5 = arith.index_cast %4 : i32 to index
    %c0 = arith.constant 0 : index
    %6 = vector.load %arg16[%5, %c0] : memref<40x32xbf16, #tpu.memory_space<vmem>>, vector<38x32xbf16>
    %c0_1 = arith.constant 0 : index
    %c0_2 = arith.constant 0 : index
    %7 = vector.load %arg8[%c0_1, %c0_2] : memref<96x32xbf16, #tpu.memory_space<vmem>>, vector<96x32xbf16>
    %c0_3 = arith.constant 0 : index
    %c0_4 = arith.constant 0 : index
    %8 = vector.load %arg9[%c0_3, %c0_4] : memref<1x32xf32, #tpu.memory_space<vmem>>, vector<1x32xf32>
    %9 = vector.extract_strided_slice %6 {offsets = [0, 0], sizes = [36, 32], strides = [1, 1]} : vector<38x32xbf16> to vector<36x32xbf16>
    %10 = vector.extract_strided_slice %6 {offsets = [1, 0], sizes = [36, 32], strides = [1, 1]} : vector<38x32xbf16> to vector<36x32xbf16>
    %11 = vector.extract_strided_slice %6 {offsets = [2, 0], sizes = [36, 32], strides = [1, 1]} : vector<38x32xbf16> to vector<36x32xbf16>
    %12 = tpu.concatenate %9, %10, %11 in 1 : vector<36x32xbf16>, vector<36x32xbf16>, vector<36x32xbf16> -> vector<36x96xbf16>
    %cst = arith.constant dense<0.000000e+00> : vector<36x32xf32>
    %13 = tpu.matmul %12, %7, %cst {dimension_numbers = #tpu.dot_dimension_numbers<[1], [0], [0], [1], [0, 0, 1, 1], [], []>} : vector<36x96xbf16>, vector<96x32xbf16>, vector<36x32xf32> -> vector<36x32xf32>
    %14 = vector.broadcast %8 : vector<1x32xf32> to vector<36x32xf32>
    %15 = arith.addf %13, %14 : vector<36x32xf32>
    %c1_i32 = arith.constant 1 : i32
    %16 = arith.subi %4, %c1_i32 : i32
    %17 = tpu.iota {dimensions = array<i32: 0>} : vector<36x1xi32>
    %18 = vector.broadcast %16 : i32 to vector<36x1xi32>
    %19 = arith.addi %18, %17 : vector<36x1xi32>
    %c0_i32_5 = arith.constant 0 : i32
    %20 = vector.broadcast %c0_i32_5 : i32 to vector<36x1xi32>
    %21 = arith.cmpi sge, %19, %20 : vector<36x1xi32>
    %c32_i32_6 = arith.constant 32 : i32
    %22 = vector.broadcast %c32_i32_6 : i32 to vector<36x1xi32>
    %23 = arith.cmpi slt, %19, %22 : vector<36x1xi32>
    %24 = arith.andi %21, %23 : vector<36x1xi1>
    %cst_7 = arith.constant 0.000000e+00 : f32
    %25 = vector.broadcast %cst_7 : f32 to vector<36x32xf32>
    %26 = arith.maximumf %15, %25 : vector<36x32xf32>
    %cst_8 = arith.constant 0.000000e+00 : f32
    %27 = vector.shape_cast %24 : vector<36x1xi1> to vector<36x1xi1>
    %28 = vector.broadcast %27 : vector<36x1xi1> to vector<36x32xi1>
    %29 = vector.broadcast %cst_8 : f32 to vector<36x32xf32>
    %30 = arith.select %28, %26, %29 : vector<36x32xi1>, vector<36x32xf32>
    %31 = arith.truncf %30 : vector<36x32xf32> to vector<36x32xbf16>
    %c0_9 = arith.constant 0 : index
    %c0_10 = arith.constant 0 : index
    %32 = vector.load %arg10[%c0_9, %c0_10] : memref<96x32xbf16, #tpu.memory_space<vmem>>, vector<96x32xbf16>
    %c0_11 = arith.constant 0 : index
    %c0_12 = arith.constant 0 : index
    %33 = vector.load %arg11[%c0_11, %c0_12] : memref<1x32xf32, #tpu.memory_space<vmem>>, vector<1x32xf32>
    %34 = vector.extract_strided_slice %31 {offsets = [0, 0], sizes = [34, 32], strides = [1, 1]} : vector<36x32xbf16> to vector<34x32xbf16>
    %35 = vector.extract_strided_slice %31 {offsets = [1, 0], sizes = [34, 32], strides = [1, 1]} : vector<36x32xbf16> to vector<34x32xbf16>
    %36 = vector.extract_strided_slice %31 {offsets = [2, 0], sizes = [34, 32], strides = [1, 1]} : vector<36x32xbf16> to vector<34x32xbf16>
    %37 = tpu.concatenate %34, %35, %36 in 1 : vector<34x32xbf16>, vector<34x32xbf16>, vector<34x32xbf16> -> vector<34x96xbf16>
    %cst_13 = arith.constant dense<0.000000e+00> : vector<34x32xf32>
    %38 = tpu.matmul %37, %32, %cst_13 {dimension_numbers = #tpu.dot_dimension_numbers<[1], [0], [0], [1], [0, 0, 1, 1], [], []>} : vector<34x96xbf16>, vector<96x32xbf16>, vector<34x32xf32> -> vector<34x32xf32>
    %39 = vector.broadcast %33 : vector<1x32xf32> to vector<34x32xf32>
    %40 = arith.addf %38, %39 : vector<34x32xf32>
    %cst_14 = arith.constant 0.000000e+00 : f32
    %41 = vector.broadcast %cst_14 : f32 to vector<34x32xf32>
    %42 = arith.maximumf %40, %41 : vector<34x32xf32>
    %43 = arith.truncf %42 : vector<34x32xf32> to vector<34x32xbf16>
    %c0_15 = arith.constant 0 : index
    %c0_16 = arith.constant 0 : index
    %44 = vector.load %arg12[%c0_15, %c0_16] : memref<96x1152xbf16, #tpu.memory_space<vmem>>, vector<96x1152xbf16>
    %c0_17 = arith.constant 0 : index
    %c0_18 = arith.constant 0 : index
    %45 = vector.load %arg13[%c0_17, %c0_18] : memref<1x1152xf32, #tpu.memory_space<vmem>>, vector<1x1152xf32>
    %46 = vector.extract_strided_slice %43 {offsets = [0, 0], sizes = [32, 32], strides = [1, 1]} : vector<34x32xbf16> to vector<32x32xbf16>
    %47 = vector.extract_strided_slice %43 {offsets = [1, 0], sizes = [32, 32], strides = [1, 1]} : vector<34x32xbf16> to vector<32x32xbf16>
    %48 = vector.extract_strided_slice %43 {offsets = [2, 0], sizes = [32, 32], strides = [1, 1]} : vector<34x32xbf16> to vector<32x32xbf16>
    %49 = tpu.concatenate %46, %47, %48 in 1 : vector<32x32xbf16>, vector<32x32xbf16>, vector<32x32xbf16> -> vector<32x96xbf16>
    %cst_19 = arith.constant dense<0.000000e+00> : vector<32x1152xf32>
    %50 = tpu.matmul %49, %44, %cst_19 {dimension_numbers = #tpu.dot_dimension_numbers<[1], [0], [0], [1], [0, 0, 1, 1], [], []>} : vector<32x96xbf16>, vector<96x1152xbf16>, vector<32x1152xf32> -> vector<32x1152xf32>
    %51 = vector.broadcast %45 : vector<1x1152xf32> to vector<32x1152xf32>
    %52 = arith.addf %50, %51 : vector<32x1152xf32>
    %c0_20 = arith.constant 0 : index
    %c0_21 = arith.constant 0 : index
    %c0_22 = arith.constant 0 : index
    %53 = vector.load %arg14[%c0_20, %c0_21, %c0_22] : memref<1x32x1152xf32, #tpu.memory_space<vmem>>, vector<1x32x1152xf32>
    %54 = vector.shape_cast %53 : vector<1x32x1152xf32> to vector<32x1152xf32>
    %55 = vector.shape_cast %52 : vector<32x1152xf32> to vector<1x32x1152xf32>
    tpu.vector_store %arg14[%c0_20, %c0_21, %c0_22], %55 {strides = array<i32>} : memref<1x32x1152xf32, #tpu.memory_space<vmem>>, vector<1x32x1152xf32>,
    return
  }
  func.func @transform_0(%arg0: i32, %arg1: i32) -> (i32, i32, i32) {
    %c0_i32 = arith.constant 0 : i32
    %c0_i32_0 = arith.constant 0 : i32
    %c0_i32_1 = arith.constant 0 : i32
    return %arg0, %c0_i32, %c0_i32_0 : i32, i32, i32
  }
  func.func @transform_1(%arg0: i32, %arg1: i32) -> (i32, i32, i32) {
    %c0_i32 = arith.constant 0 : i32
    %c0_i32_0 = arith.constant 0 : i32
    %c0_i32_1 = arith.constant 0 : i32
    return %arg0, %c0_i32, %c0_i32_0 : i32, i32, i32
  }
  func.func @transform_2(%arg0: i32, %arg1: i32) -> (i32, i32) {
    %c0_i32 = arith.constant 0 : i32
    %c0_i32_0 = arith.constant 0 : i32
    %c0_i32_1 = arith.constant 0 : i32
    return %c0_i32, %c0_i32_0 : i32, i32
  }
  func.func @transform_3(%arg0: i32, %arg1: i32) -> (i32, i32) {
    %c0_i32 = arith.constant 0 : i32
    %c0_i32_0 = arith.constant 0 : i32
    %c0_i32_1 = arith.constant 0 : i32
    return %c0_i32, %c0_i32_0 : i32, i32
  }
  func.func @transform_4(%arg0: i32, %arg1: i32) -> (i32, i32, i32) {
    %c0_i32 = arith.constant 0 : i32
    %c0_i32_0 = arith.constant 0 : i32
    %c0_i32_1 = arith.constant 0 : i32
    %c0_i32_2 = arith.constant 0 : i32
    return %c0_i32, %c0_i32_0, %c0_i32_1 : i32, i32, i32
  }
  func.func @transform_5(%arg0: i32, %arg1: i32) -> (i32, i32, i32) {
    %c0_i32 = arith.constant 0 : i32
    %c0_i32_0 = arith.constant 0 : i32
    %c0_i32_1 = arith.constant 0 : i32
    %c0_i32_2 = arith.constant 0 : i32
    return %c0_i32, %c0_i32_0, %c0_i32_1 : i32, i32, i32
  }
  func.func @transform_6(%arg0: i32, %arg1: i32) -> (i32, i32) {
    %c0_i32 = arith.constant 0 : i32
    %c0_i32_0 = arith.constant 0 : i32
    %c0_i32_1 = arith.constant 0 : i32
    return %c0_i32, %c0_i32_0 : i32, i32
  }
  func.func @transform_7(%arg0: i32, %arg1: i32) -> (i32, i32) {
    %c0_i32 = arith.constant 0 : i32
    %c0_i32_0 = arith.constant 0 : i32
    %c0_i32_1 = arith.constant 0 : i32
    return %c0_i32, %c0_i32_0 : i32, i32
  }
  func.func @transform_8(%arg0: i32, %arg1: i32) -> (i32, i32) {
    %c0_i32 = arith.constant 0 : i32
    %c0_i32_0 = arith.constant 0 : i32
    %c0_i32_1 = arith.constant 0 : i32
    return %c0_i32, %c0_i32_0 : i32, i32
  }
  func.func @transform_9(%arg0: i32, %arg1: i32) -> (i32, i32) {
    %c0_i32 = arith.constant 0 : i32
    %c0_i32_0 = arith.constant 0 : i32
    %c0_i32_1 = arith.constant 0 : i32
    return %c0_i32, %c0_i32_0 : i32, i32
  }
  func.func @transform_10(%arg0: i32, %arg1: i32) -> (i32, i32) {
    %c0_i32 = arith.constant 0 : i32
    %c0_i32_0 = arith.constant 0 : i32
    %c0_i32_1 = arith.constant 0 : i32
    return %c0_i32, %c0_i32_0 : i32, i32
  }
  func.func @transform_11(%arg0: i32, %arg1: i32) -> (i32, i32) {
    %c0_i32 = arith.constant 0 : i32
    %c0_i32_0 = arith.constant 0 : i32
    %c0_i32_1 = arith.constant 0 : i32
    return %c0_i32, %c0_i32_0 : i32, i32
  }
  func.func @transform_12(%arg0: i32, %arg1: i32) -> (i32, i32, i32) {
    %c0_i32 = arith.constant 0 : i32
    %c0_i32_0 = arith.constant 0 : i32
    return %arg0, %arg1, %c0_i32 : i32, i32, i32
  }
}

</mosaic_0001>

<bundles_post_ra>
// kernel: _decoder_apply.1
= control target key start
LH: loop header
LB: loop body
LE: loop exit
PB: predicated region body
PF: predicated region fallthrough
CT: control target
= control target key end

     0   :  { %17 = vsyncpa [#allocation5], 0  ;;  %s3882_s0 = inlined_call_operand.vmem [shape: f32[2,3,32], index: 0, kind: input, shape index: {}]   ;;  %s3883_s1 = inlined_call_operand.vmem [shape: f32[2,16,8], index: 1, kind: input, shape index: {}]   ;;  %s3884_s2 = inlined_call_operand.vmem [shape: bf16[24,32], index: 2, kind: input, shape index: {}]   ;;  %s3885_s3 = inlined_call_operand.vmem [shape: f32[1,32], index: 3, kind: input, shape index: {}]   ;;  %s3886_s4 = inlined_call_operand.vmem [shape: bf16[2,96,16], index: 4, kind: input, shape index: {}]   ;;  %s3887_s5 = inlined_call_operand.hbm [shape: bf16[2,16,32], index: 5, kind: input, shape index: {}]   ;;  %s3888_s6 = inlined_call_operand.vmem [shape: bf16[96,32], index: 6, kind: input, shape index: {}]   ;;  %s3889_s7 = inlined_call_operand.hbm [shape: f32[1,32], index: 7, kind: input, shape index: {}]   ;;  %s3890_s8 = inlined_call_operand.vmem [shape: bf16[96,32], index: 8, kind: input, shape index: {}]   ;;  %s3891_s9 = inlined_call_operand.hbm [shape: f32[1,32], index: 9, kind: input, shape index: {}]   ;;  %s3892_s10 = inlined_call_operand.vmem [shape: bf16[96,1152], index: 10, kind: input, shape index: {}]   ;;  %s3893_s11 = inlined_call_operand.hbm [shape: f32[1,1152], index: 11, kind: input, shape index: {}]   ;;  %s3894_s12 = inlined_call_operand.vmem [shape: f32[2,32,1152], index: 12, kind: output, shape index: {}]  }
   0x1   :  { %18 = vsyncpa [#allocation7], 0 }
   0x2   :  { %19 = vsyncpa [#allocation10], 0  ;;  %s3235_s21 = smov 0   ;;  %s3237_s22 = smov 0  }
   0x3   :  { %s3239_s23 = smov 0  }
   0x4 LB: > { %s3157_s24 = smov [#allocation6]   ;;  %s2512_s26 = sadd.s32 4294967295, %s3155_s23   ;;  %s3155_s23 = sphi %s3239_s23, %s25_s23   ;;  %s3151_s22 = sphi %s3237_s22, %s3904_s22   ;;  %s3147_s21 = sphi %s3235_s21, %s3903_s21  }
   0x5   : > { %s370_s25 = sshll.u32 %s3157_s24, 4  ;;  %p2514_p0 = scmp.ge.s32.totalorder %s3155_s23, 1  ;;  %s371_s25 = int_to_ptr.vmem [resolvable:$true] %s370_s25 }
   0x6   : > { %p332_p1 = scmp.lt.s32.totalorder %s3155_s23, 3  ;;  %p3253_p2 = scmp.eq.s32.totalorder %s2512_s26, 0 }
   0x7   : > { %s37_s29 = sadd.s32 1, %s3151_s22  ;;  %s3158_s14 = smov [#allocation4]  }
   0x8   : > { %p3257_p3 = pnand %p2514_p0, %p332_p1  ;;  %p3270_p6 = scmp.ge.s32.totalorder %s37_s29, 2 }
   0x9   : > { %s353_s15 = sshll.u32 %s3158_s14, 4  ;;  %s3028_s16 = scalar_lea.vmem %s371_s25, 16  ;;  %s354_s15 = int_to_ptr.vmem [resolvable:$true] %s353_s15 }
   0xa   : > { %p2850_p4 = pneg %p3257_p3  ;;  %p3029_p8 = scmp.ne.s32.totalorder %s371_s25, %s3028_s16 }
   0xb   : > { %s3035_s17 = scalar_lea.vmem %s371_s25, 32  ;;  %p3036_p11 = scmp.lt.s32.totalorder %s371_s25, %s371_s25 }
   0xc   : > { %p3266_p5 = pnand %p3253_p2, %p2850_p4  ;;  %p3037_p12 = scmp.lt.s32.totalorder %s3035_s17, %s3028_s16 }
   0xe   : > { %p3019_p7 = pneg %p3266_p5  ;;  %p3038_p13 = por %p3037_p12, %p3036_p11 }
  0x10   : > { %p3031_p9 = pnand %p3029_p8, %p3019_p7 }
  0x12   : > { %p3032_p10 = pneg %p3031_p9 }
  0x14   : > { %p3039_p0 = pnand %p3038_p13, %p3032_p10 }
  0x16   : > { %3042 = shalt.err (!%p3039_p0)
}
  0x17   : > { %2856 = dma.hbm_to_vmem [thread:$0]  (!%p3266_p5), %s3889_s7, 16, %s371_s25, [#allocation7]  }
  0x18   : > { %s3906_s29 = smov (%p3270_p6, %s37_s29), 0  ;;  %s3054_s20 = scalar_lea.vmem %s354_s15, 256 }
  0x19   : > { %p3055_p1 = scmp.ne.s32.totalorder %s354_s15, %s3054_s20  ;;  %p3062_p9 = scmp.lt.s32.totalorder %s354_s15, %s354_s15 }
  0x1a   : > { %p3063_p10 = scmp.lt.s32.totalorder %s3054_s20, %s3054_s20 }
  0x1b   : > { %p3057_p4 = pnand %p3055_p1, %p3019_p7 }
  0x1c   : > { %p3064_p11 = por %p3063_p10, %p3062_p9 }
  0x1d   : > { %p3058_p8 = pneg %p3057_p4 }
  0x1f   : > { %p3065_p12 = pnand %p3064_p11, %p3058_p8 }
  0x21   : > { %3068 = shalt.err (!%p3065_p12)
}
  0x22   : > { %s3159_s24 = smov 64   ;;  %s3160_s26 = smov 4  }
  0x23   : > { %2853 = dma.hbm_to_vmem [thread:$0]  (!%p3266_p5), %s3887_s5, 256, %s354_s15, [#allocation5], %s3159_s24, %s3159_s24, %s3160_s26  }
  0x24   : > { %s3161_s14 = smov [#allocation8]   ;;  %s3162_s17 = smov [#allocation9]  }
  0x25   : > { %s384_s16 = sshll.u32 %s3161_s14, 4  ;;  %s398_s18 = sshll.u32 %s3162_s17, 4  ;;  %s385_s16 = int_to_ptr.vmem [resolvable:$true] %s384_s16  ;;  %s399_s18 = int_to_ptr.vmem [resolvable:$true] %s398_s18 }
  0x26   : > { %s3080_s19 = scalar_lea.vmem %s385_s16, 16  ;;  %s3087_s20 = scalar_lea.vmem %s385_s16, 32 }
  0x27   : > { %p3081_p6 = scmp.ne.s32.totalorder %s385_s16, %s3080_s19  ;;  %p3088_p1 = scmp.lt.s32.totalorder %s385_s16, %s385_s16 }
  0x28   : > { %p3089_p4 = scmp.lt.s32.totalorder %s3087_s20, %s3080_s19 }
  0x29   : > { %p3083_p13 = pnand %p3081_p6, %p3019_p7 }
  0x2a   : > { %p3090_p8 = por %p3089_p4, %p3088_p1 }
  0x2b   : > { %p3084_p0 = pneg %p3083_p13 }
  0x2d   : > { %p3091_p9 = pnand %p3090_p8, %p3084_p0 }
  0x2f   : > { %3094 = shalt.err (!%p3091_p9)
}
  0x30   : > { %2859 = dma.hbm_to_vmem [thread:$0]  (!%p3266_p5), %s3891_s9, 16, %s385_s16, [#allocation7]  }
  0x31   : > { %s3106_s26 = scalar_lea.vmem %s399_s18, 144  ;;  %s3113_s25 = scalar_lea.vmem %s399_s18, 160 }
  0x32   : > { %p3107_p10 = scmp.ne.s32.totalorder %s399_s18, %s3106_s26  ;;  %p3114_p6 = scmp.lt.s32.totalorder %s399_s18, %s399_s18 }
  0x33   : > { %p3115_p13 = scmp.lt.s32.totalorder %s3113_s25, %s3106_s26 }
  0x34   : > { %p3109_p11 = pnand %p3107_p10, %p3019_p7 }
  0x35   : > { %p3116_p1 = por %p3115_p13, %p3114_p6 }
  0x36   : > { %p3110_p12 = pneg %p3109_p11 }
  0x38   : > { %p3117_p0 = pnand %p3116_p1, %p3110_p12 }
  0x3a   : > { %3120 = shalt.err (!%p3117_p0)
}
  0x3b   : > { %2862 = dma.hbm_to_vmem [thread:$0]  (!%p3266_p5), %s3893_s11, 144, %s399_s18, [#allocation10]  }
  0x3c   : > { %426 = sbr.rel (%p3257_p3) target bundleno = 2567 (0xa07), region = 68 }
  0x41   : > { %3134 = dma.done.wait (%p3253_p2), [#allocation5], 256  }
  0x42   : > { %3136 = vsyncadd (%p3253_p2), [#allocation5], 4294967040 }
  0x43   : > { %3138 = dma.done.wait (%p3253_p2), [#allocation7], 32  }
  0x44   : > { %3140 = vsyncadd (%p3253_p2), [#allocation7], 4294967264 }
  0x45   : > { %3142 = dma.done.wait (%p3253_p2), [#allocation10], 144  }
  0x46   : > { %3144 = vsyncadd (%p3253_p2), [#allocation10], 4294967152  ;;  %p489_p3 = scmp.lt.s32.totalorder %s3147_s21, 1  ;;  %v3163_v0 = vmov 0.0   ;;  %vm528_vm0 = vsmask.f32 256  ;;  %v628_v32 = vlaneseq }
  0x47   : > { %2717 = vmatprep.subr.bf16.mxu0 %v3163_v0  ;;  %vm527_vm1 = vcmask 1040384   ;;  %vm583_vm2 = vcmask 1043456   ;;  %v2908_v4 = vld [vmem:[%s3884_s2 + $0x8] ss:$0 sps:$4 sm:$0xff]   ;;  %v2909_v9 = vld [vmem:[%s3884_s2] sm:$0xff]   ;;  %vm3164_vm5 = vmmov 0  }
  0x48   : > { %s3908_s21 = smov (!%p489_p3, %s3147_s21), 1  ;;  %vm3340_vm3 = vmand %vm527_vm1, %vm528_vm0  ;;  %v585_v8 = vsel %vm583_vm2, %v2908_v4, 0  ;;  %vm536_vm4 = vsmask.f32 7424  ;;  %2721 = vmatprep.mubr.msk.bf16.mxu0 %vm3164_vm5, %v3163_v0  ;;  %vm553_vm6 = vcmask 1046528   ;;  %s3165_s15 = smov 8  }
  0x49   : > { %s2661_s28 = sshll.u32 %s3908_s21, 4  ;;  %2718 = vmatpush3.bf16.msra.mxu0 %v585_v8  ;;  %s3166_s24 = smov 16   ;;  %vm559_vm7 = vcmask 64512   ;;  %vm562_vm8 = vcmask 130048   ;;  %vm580_vm9 = vcmask 195584   ;;  %v2910_v28 = vld [vmem:[%s3886_s4 + $0x28] sm:$0xff]  }
  0x4a   : > { %s497_s17 = scalar_lea.vmem %s3883_s1, %s2661_s28  ;;  %2719 = vmatprep.subr.bf16.mxu0 %v3163_v0  ;;  %v2911_v29 = vld [vmem:[%s3886_s4 + $0x20] sm:$0xff]   ;;  %2725 = vmatprep.subr.bf16.mxu1 %v2910_v28  ;;  %v2912_v30 = vld [vmem:[%s3886_s4 + $0x18] sm:$0xff]   ;;  %v2913_v31 = vld [vmem:[%s3886_s4 + $0x10] sm:$0xff]   ;;  %s2525_s27 = sshll.u32 %s3908_s21, 2  ;;  %v3370_v33 = vshrl.u32 %v628_v32, 7  ;;  %vm748_vm12 = vcmask 261120  }
  0x4b   : > { %v514_v1 = vld [vmem:[%s497_s17] sm:$0xff]  ;;  %v515_v2 = vld [vmem:[%s497_s17 + $0x8] sm:$0xff]  ;;  %2726 = vmatpush3.bf16.msra.mxu1 %v2910_v28  ;;  %s492_s20 = scalar_lea.vmem %s3882_s0, %s2525_s27  ;;  %s3167_s28 = smov 64   ;;  %vm753_vm13 = vcmask 523264   ;;  %vm794_vm14 = vcmask 785408   ;;  %vm1165_vm15 = vcmask 257024  }
  0x4c   : > { %v517_v3 = vpack.c.bf16 %v515_v2, %v514_v1  ;;  %2727 = vmatprep.subr.bf16.mxu1 %v2911_v29  ;;  %v645_v34 = vsub.s32 1, %v3370_v33  ;;  %v516_v35 = vld [vmem:[%s492_s20] sm:$0x7]  ;;  %v633_v36 = vsub.s32 0, %v3370_v33  ;;  %v659_v39 = vsub.s32 2, %v3370_v33  ;;  %s3168_s30 = smov 32  }
  0x4d   : > { %2720 = vmatpush3.bf16.msra.mxu0 %v2909_v9  ;;  %v2529_v37 = vld [vmem:[%s3885_s3] ss:$0 sm:$0xff]  ;;  %vm637_vm10 = vcmp.eq.s32.totalorder %v3370_v33, 0  ;;  %v630_v41 = vadd.s32 8, %v3370_v33  ;;  %vm1205_vm2 = vcmask 257025   ;;  %s2833_s19 = smul.u32 288, %s3908_s21 }
  0x4e   : > { %v519_v5 = vshrl.u32 %v517_v3, 16  ;;  %v522_v6 = vshll.u32 %v517_v3, 16  ;;  %v646_v38 = vrot.slane %v516_v35, %v645_v34  ;;  %v634_v40 = vrot.slane %v516_v35, %v633_v36 }
  0x4f   : > { %2728 = vmatpush3.bf16.msra.mxu1 %v2911_v29  ;;  %v660_v46 = vrot.slane %v516_v35, %v659_v39  ;;  %vm652_vm11 = vcmp.eq.s32.totalorder %v630_v41, 15 }
  0x50   : > { %v521_v10 = vrot.slane %v519_v5, 7  ;;  %2729 = vmatprep.subr.bf16.mxu1 %v2912_v30  ;;  %v647_v44 = vsel %vm637_vm10, %v646_v38, 0.0  ;;  %v2914_v5 = vld [vmem:[%s3886_s4 + $0x8] sm:$0xff]  }
  0x51   : > { %v662_v51 = vsel %vm652_vm11, %v660_v46, 0.0 }
  0x52   : > { %v524_v11 = vor.u32 %v522_v6, %v521_v10  ;;  %v531_v12 = vsel %vm3340_vm3, %v521_v10, 0 }
  0x53   : > { %v545_v13 = vshll.u32 %v531_v12, 16  ;;  %v555_v17 = vrot.slane %v531_v12, 1  ;;  %2730 = vmatpush3.bf16.msra.mxu1 %v2912_v30 }
  0x54   : > { %v530_v14 = vsel %vm3340_vm3, 0, %v524_v11  ;;  %2731 = vmatprep.subr.bf16.mxu1 %v2913_v31 }
  0x55   : > { %v538_v15 = vshrl.u32 %v530_v14, 16  ;;  %v540_v16 = vshll.u32 %v530_v14, 16  ;;  %v547_v18 = vrot.slane %v545_v13, 1  ;;  %v554_v19 = vrot.slane %v530_v14, 1  ;;  %v2915_v13 = vld [vmem:[%s3886_s4] sm:$0xff]  }
  0x57   : > { %v542_v20 = vrot.slane %v540_v16, 1  ;;  %v556_v23 = vsel %vm553_vm6, %v554_v19, %v555_v17  ;;  %2732 = vmatpush3.bf16.msra.mxu1 %v2913_v31 }
  0x58   : > { %2733 = vmatprep.subr.bf16.mxu1 %v2914_v5 }
  0x59   : > { %v543_v21 = vor.u32 %v542_v20, %v538_v15 }
  0x5b   : > { %v548_v22 = vsel %vm536_vm4, %v543_v21, %v547_v18  ;;  %2734 = vmatpush3.bf16.msra.mxu1 %v2914_v5 }
  0x5c   : > { %549 = vrot.lane.b32.xlu0 %v548_v22, %s3165_s15  ;;  %2735 = vmatprep.subr.bf16.mxu1 %v2915_v13 }
  0x5f   : > { %2736 = vmatpush3.bf16.msra.mxu1 %v2915_v13 }
  0x60   : > { %557 = vrot.lane.b32.xlu0 %v556_v23, %s3166_s24  ;;  %s3827_s24 = scalar_lea.vmem %s3894_s12, %s2833_s19 }
  0xce   : > { %v550_v24 = vpop.permute.xlu0 %549 }
  0xcf   : > { %v561_v25 = vsel %vm559_vm7, %v530_v14, %v550_v24  ;;  %vm1210_vm7 = vcmask 253952  }
  0xd2   : > { %v558_v26 = vpop.permute.xlu0 %557 }
  0xd3   : > { %v564_v27 = vsel %vm562_vm8, %v561_v25, %v558_v26 }
  0xd4   : > { %2722 = vmatmul.mubr.msk.bf16.vlgmr.msra.gmra.mxu0 %vm580_vm9, %v564_v27 }
 0x194   : > { %v621_v42 = vpop.f32.mrf.mxu0 }
 0x195   : > { %v622_v43 = vadd.f32 %v2529_v37, %v621_v42 }
 0x196   : > { %v2723_v45 = vpop.f32.mrf.mxu0 }
 0x197   : > { %v635_v47 = vadd.f32 %v634_v40, %v622_v43  ;;  %v2916_v45 = vld [vmem:[#allocation4] sm:$0xff]  }
 0x198   : > { %v624_v48 = vpop.f32.mrf.mxu0  ;;  %2741 = vmatprep.subr.bf16.mxu0 %v2916_v45 }
 0x199   : > { %v649_v49 = vsub.f32 %v635_v47, %v647_v44  ;;  %v625_v50 = vadd.f32 %v2529_v37, %v624_v48  ;;  %2742 = vmatpush3.bf16.msra.mxu0 %v2916_v45 }
 0x19a   : > { %v2724_v52 = vpop.f32.mrf.mxu0 }
 0x19b   : > { %665 = vst [vmem:[#allocation2] ss:$2 sm:$0xff] %v649_v49  ;;  %669 = vst [vmem:[#allocation2 + $0x1] ss:$2 sm:$0xff] %v649_v49  ;;  %v636_v53 = vadd.f32 %v634_v40, %v625_v50 }
 0x19d   : > { %v664_v54 = vsub.f32 %v636_v53, %v662_v51 }
 0x19f   : > { %667 = vst [vmem:[#allocation2 + $0x10] ss:$2 sm:$0xff] %v664_v54  ;;  %671 = vst [vmem:[#allocation2 + $0x11] ss:$2 sm:$0xff] %v664_v54 }
 0x1a2   : > { %v3389_v55 = vld [vmem:[#allocation2] sm:$0xff]  ;;  %v3391_v56 = vld [vmem:[#allocation2 + $0x8] sm:$0xff] }
 0x1a3   : > { %v676_v57 = vmax.f32 %v3389_v55, 0.0  ;;  %v677_v58 = vmax.f32 %v3391_v56, 0.0 }
 0x1a5   : > { %v680_v59 = vpack.c.bf16 %v677_v58, %v676_v57  ;;  %v2917_v58 = vld [vmem:[%s3886_s4 + $0x58] sm:$0xff]  }
 0x1a6   : > { %v3395_v60 = vld [vmem:[#allocation2 + $0x10] sm:$0xff]  ;;  %v3397_v61 = vld [vmem:[#allocation2 + $0x18] sm:$0xff]  ;;  %2747 = vmatprep.subr.bf16.mxu0 %v2917_v58 }
 0x1a7   : > { %v678_v62 = vmax.f32 %v3395_v60, 0.0  ;;  %v679_v63 = vmax.f32 %v3397_v61, 0.0  ;;  %v683_v1 = vshrl.u32 %v680_v59, 16  ;;  %v686_v4 = vshll.u32 %v680_v59, 16  ;;  %v2918_v59 = vld [vmem:[%s3886_s4 + $0x50] sm:$0xff]  }
 0x1a9   : > { %v681_v2 = vpack.c.bf16 %v679_v63, %v678_v62  ;;  %v685_v3 = vrot.slane %v683_v1, 7  ;;  %v2919_v62 = vld [vmem:[%s3886_s4 + $0x48] sm:$0xff]   ;;  %v2920_v63 = vld [vmem:[%s3886_s4 + $0x40] sm:$0xff]  }
 0x1ab   : > { %v688_v6 = vor.u32 %v686_v4, %v685_v3  ;;  %v690_v8 = vshrl.u32 %v681_v2, 16  ;;  %v693_v10 = vshll.u32 %v681_v2, 16 }
 0x1ad   : > { %v692_v9 = vrot.slane %v690_v8, 7  ;;  %v699_v11 = vsel %vm3340_vm3, 0, %v688_v6 }
 0x1ae   : > { %v716_v12 = vshll.u32 %v699_v11, 16  ;;  %v739_v18 = vrot.slane %v699_v11, 1  ;;  %v714_v20 = vshrl.u32 %v699_v11, 16 }
 0x1af   : > { %v695_v14 = vor.u32 %v693_v10, %v692_v9  ;;  %v700_v16 = vsel %vm3340_vm3, %v692_v9, 0 }
 0x1b0   : > { %v718_v15 = vrot.slane %v716_v12, 1  ;;  %v729_v22 = vshll.u32 %v700_v16, 16  ;;  %v742_v31 = vrot.slane %v700_v16, 1 }
 0x1b1   : > { %v696_v17 = vsel %vm528_vm0, %v685_v3, %v695_v14 }
 0x1b2   : > { %v740_v19 = vrot.slane %v696_v17, 1  ;;  %v721_v21 = vshll.u32 %v696_v17, 16  ;;  %v719_v24 = vor.u32 %v718_v15, %v714_v20  ;;  %v725_v26 = vshrl.u32 %v696_v17, 16 }
 0x1b3   : > { %v731_v29 = vrot.slane %v729_v22, 1 }
 0x1b4   : > { %v741_v23 = vsel %vm553_vm6, %v739_v18, %v740_v19  ;;  %v723_v25 = vrot.slane %v721_v21, 1  ;;  %v743_v32 = vsel %vm553_vm6, %v740_v19, %v742_v31  ;;  %v2922_v21 = vld [vmem:[%s3886_s4 + $0x30] sm:$0xff]  }
 0x1b5   : > { %744 = vrot.lane.b32.xlu0 %v741_v23, %s3167_s28 }
 0x1b6   : > { %v724_v27 = vsel %vm536_vm4, %v719_v24, %v723_v25  ;;  %v727_v28 = vor.u32 %v725_v26, %v723_v25 }
 0x1b7   : > { %733 = vrot.lane.b32.xlu1 %v724_v27, %s3168_s30 }
 0x1b8   : > { %v732_v30 = vsel %vm536_vm4, %v727_v28, %v731_v29 }
 0x1bb   : > { %735 = vrot.lane.b32.xlu1 %v732_v30, %s3168_s30 }
 0x1bf   : > { %746 = vrot.lane.b32.xlu1 %v743_v32, %s3167_s28 }
 0x227   : > { %v745_v37 = vpop.permute.xlu0 %744 }
 0x229   : > { %v734_v35 = vpop.permute.xlu1 %733 }
 0x22a   : > { %v750_v38 = vsel %vm748_vm12, %v699_v11, %v734_v35 }
 0x22b   : > { %v755_v40 = vsel %vm753_vm13, %v750_v38, %v745_v37 }
 0x22c   : > { %2737 = vmatprep.mubr.msk.bf16.mxu1 %vm794_vm14, %v755_v40 }
 0x22d   : > { %v736_v41 = vpop.permute.xlu1 %735 }
 0x22e   : > { %v752_v42 = vsel %vm748_vm12, %v696_v17, %v736_v41 }
 0x231   : > { %v747_v43 = vpop.permute.xlu1 %746 }
 0x232   : > { %v757_v44 = vsel %vm753_vm13, %v752_v42, %v747_v43 }
 0x233   : > { %2738 = vmatmul.mubr.msk.bf16.vlgmr.msra.gmra.mxu1 %vm794_vm14, %v757_v44 }
 0x2f3   : > { %v2739_v46 = vpop.f32.mrf.mxu1 }
 0x2f4   : > { %v850_v53 = vmax.f32 %v2739_v46, 0.0 }
 0x2f5   : > { %v833_v47 = vpop.f32.mrf.mxu1 }
 0x2f6   : > { %v848_v51 = vmax.f32 %v833_v47, 0.0 }
 0x2f7   : > { %v2740_v48 = vpop.f32.mrf.mxu1 }
 0x2f8   : > { %v851_v49 = vmax.f32 %v2740_v48, 0.0 }
 0x2f9   : > { %v836_v50 = vpop.f32.mrf.mxu1 }
 0x2fa   : > { %v849_v52 = vmax.f32 %v836_v50, 0.0  ;;  %v853_v57 = vpack.c.bf16 %v851_v49, %v850_v53  ;;  %v2923_v53 = vld [vmem:[#allocation4 + $0x8] sm:$0xff]  }
 0x2fb   : > { %2763 = vmatprep.subr.bf16.mxu1 %v2923_v53 }
 0x2fc   : > { %v852_v54 = vpack.c.bf16 %v849_v52, %v848_v51  ;;  %2764 = vmatpush3.bf16.msra.mxu1 %v2923_v53 }
 0x2fd   : > { %2769 = vmatprep.subr.bf16.mxu1 %v3163_v0 }
 0x2fe   : > { %2743 = vmatprep.mubr.msk.bf16.mxu0 %vm562_vm8, %v852_v54 }
 0x2ff   : > { %2744 = vmatmul.mubr.msk.bf16.vlgmr.msra.gmra.mxu0 %vm562_vm8, %v853_v57 }
 0x300   : > { %2748 = vmatpush3.bf16.msra.mxu0 %v2917_v58 }
 0x301   : > { %2749 = vmatprep.subr.bf16.mxu0 %v2918_v59 }
 0x304   : > { %2750 = vmatpush3.bf16.msra.mxu0 %v2918_v59 }
 0x305   : > { %2751 = vmatprep.subr.bf16.mxu0 %v2919_v62 }
 0x308   : > { %2752 = vmatpush3.bf16.msra.mxu0 %v2919_v62 }
 0x309   : > { %2753 = vmatprep.subr.bf16.mxu0 %v2920_v63 }
 0x30c   : > { %2754 = vmatpush3.bf16.msra.mxu0 %v2920_v63 }
 0x3bf   : > { %v2745_v1 = vpop.f32.mrf.mxu0 }
 0x3c0   : > { %v3441_v3 = vadd.f32 %v2745_v1, %v3395_v60 }
 0x3c1   : > { %v902_v2 = vpop.f32.mrf.mxu0 }
 0x3c2   : > { %v3444_v5 = vadd.f32 %v902_v2, %v3389_v55  ;;  %v923_v9 = vmax.f32 %v3441_v3, 0.0  ;;  %v2921_v55 = vld [vmem:[%s3886_s4 + $0x38] sm:$0xff]  }
 0x3c3   : > { %v2746_v4 = vpop.f32.mrf.mxu0  ;;  %2755 = vmatprep.subr.bf16.mxu0 %v2921_v55 }
 0x3c4   : > { %v3447_v6 = vadd.f32 %v2746_v4, %v3397_v61  ;;  %v921_v12 = vmax.f32 %v3444_v5, 0.0  ;;  %2756 = vmatpush3.bf16.msra.mxu0 %v2921_v55 }
 0x3c5   : > { %v905_v8 = vpop.f32.mrf.mxu0  ;;  %2757 = vmatprep.subr.bf16.mxu0 %v2922_v21 }
 0x3c6   : > { %v924_v10 = vmax.f32 %v3447_v6, 0.0  ;;  %v3452_v11 = vadd.f32 %v905_v8, %v3391_v56 }
 0x3c8   : > { %v926_v13 = vpack.c.bf16 %v924_v10, %v923_v9  ;;  %v922_v60 = vmax.f32 %v3452_v11, 0.0  ;;  %2758 = vmatpush3.bf16.msra.mxu0 %v2922_v21  ;;  %v3169_v9 = vmov 0   ;;  %v2927_v10 = vld [vmem:[%s3888_s6 + $0x28] sm:$0xff]  }
 0x3c9   : > { %2793 = vmatprep.subr.bf16.mxu0 %v3163_v0  ;;  %1166 = vst.msk [vmem:[#allocation3] sm:$0xf] %vm1165_vm15, %v3169_v9  ;;  %1167 = vst.msk [vmem:[#allocation3 + $0x4] sm:$0xf] %vm1165_vm15, %v3169_v9 }
 0x3ca   : > { %v935_v14 = vshrl.u32 %v926_v13, 16  ;;  %v925_v15 = vpack.c.bf16 %v922_v60, %v921_v12  ;;  %v938_v16 = vshll.u32 %v926_v13, 16  ;;  %1168 = vst.msk [vmem:[#allocation3 + $0x8] sm:$0xf] %vm1165_vm15, %v3169_v9  ;;  %1169 = vst.msk [vmem:[#allocation3 + $0xc] sm:$0xf] %vm1165_vm15, %v3169_v9 }
 0x3cb   : > { %1170 = vst.msk [vmem:[#allocation3 + $0x10] sm:$0xf] %vm1165_vm15, %v3169_v9  ;;  %v2928_v12 = vld [vmem:[%s3888_s6 + $0x20] sm:$0xff]   ;;  %v2929_v13 = vld [vmem:[%s3888_s6 + $0x18] sm:$0xff]   ;;  %v2930_v60 = vld [vmem:[%s3888_s6 + $0x10] sm:$0xff]  }
 0x3cc   : > { %v937_v61 = vrot.slane %v935_v14, 7  ;;  %v928_v17 = vshrl.u32 %v925_v15, 16  ;;  %v931_v56 = vshll.u32 %v925_v15, 16  ;;  %v2931_v14 = vld [vmem:[%s3888_s6 + $0x8] sm:$0xff]  }
 0x3ce   : > { %v940_v18 = vor.u32 %v938_v16, %v937_v61  ;;  %v930_v19 = vrot.slane %v928_v17, 7  ;;  %v945_v20 = vsel %vm3340_vm3, %v937_v61, 0 }
 0x3cf   : > { %v975_v25 = vshll.u32 %v945_v20, 16  ;;  %v988_v42 = vrot.slane %v945_v20, 1 }
 0x3d0   : > { %v933_v22 = vor.u32 %v931_v56, %v930_v19  ;;  %v941_v23 = vsel %vm528_vm0, %v930_v19, %v940_v18  ;;  %vm1187_vm0 = vcmask 1044484  }
 0x3d1   : > { %v967_v24 = vshll.u32 %v941_v23, 16  ;;  %v971_v28 = vshrl.u32 %v941_v23, 16  ;;  %v977_v31 = vrot.slane %v975_v25, 1  ;;  %v986_v40 = vrot.slane %v941_v23, 1 }
 0x3d2   : > { %v944_v26 = vsel %vm3340_vm3, 0, %v933_v22  ;;  %vm3524_vm3 = vmor %vm527_vm1, %vm1187_vm0 }
 0x3d3   : > { %v969_v27 = vrot.slane %v967_v24, 1  ;;  %v962_v29 = vshll.u32 %v944_v26, 16  ;;  %v960_v32 = vshrl.u32 %v944_v26, 16  ;;  %v985_v7 = vrot.slane %v944_v26, 1 }
 0x3d4   : > { %v989_v43 = vsel %vm553_vm6, %v986_v40, %v988_v42 }
 0x3d5   : > { %v973_v30 = vor.u32 %v971_v28, %v969_v27  ;;  %v964_v35 = vrot.slane %v962_v29, 1  ;;  %v987_v44 = vsel %vm553_vm6, %v985_v7, %v986_v40 }
 0x3d7   : > { %v978_v37 = vsel %vm536_vm4, %v973_v30, %v977_v31  ;;  %v965_v38 = vor.u32 %v964_v35, %v960_v32 }
 0x3d8   : > { %981 = vrot.lane.b32.xlu1 %v978_v37, %s3168_s30 }
 0x3d9   : > { %v970_v41 = vsel %vm536_vm4, %v965_v38, %v969_v27  ;;  %v2932_v38 = vld [vmem:[%s3888_s6] sm:$0xff]  }
 0x3da   : > { %979 = vrot.lane.b32.xlu0 %v970_v41, %s3168_s30 }
 0x3dc   : > { %992 = vrot.lane.b32.xlu1 %v989_v43, %s3167_s28 }
 0x3de   : > { %990 = vrot.lane.b32.xlu0 %v987_v44, %s3167_s28 }
 0x44a   : > { %v982_v45 = vpop.permute.xlu1 %981 }
 0x44b   : > { %v997_v50 = vsel %vm748_vm12, %v941_v23, %v982_v45 }
 0x44c   : > { %v980_v46 = vpop.permute.xlu0 %979 }
 0x44d   : > { %v995_v48 = vsel %vm748_vm12, %v944_v26, %v980_v46 }
 0x44e   : > { %v993_v47 = vpop.permute.xlu1 %992 }
 0x44f   : > { %v1001_v52 = vsel %vm753_vm13, %v997_v50, %v993_v47 }
 0x450   : > { %v991_v49 = vpop.permute.xlu0 %990 }
 0x451   : > { %v999_v51 = vsel %vm753_vm13, %v995_v48, %v991_v49 }
 0x452   : > { %2759 = vmatprep.mubr.msk.bf16.mxu0 %vm794_vm14, %v999_v51 }
 0x453   : > { %2760 = vmatmul.mubr.msk.bf16.vlgmr.msra.gmra.mxu0 %vm794_vm14, %v1001_v52 }
 0x454   : > { %2805 = vmatprep.mubr.msk.bf16.mxu0 %vm3164_vm5, %v3163_v0 }
 0x513   : > { %v2761_v54 = vpop.f32.mrf.mxu0 }
 0x514   : > { %v1093_v2 = vmax.f32 %v2761_v54, 0.0 }
 0x515   : > { %v1076_v57 = vpop.f32.mrf.mxu0 }
 0x516   : > { %v1091_v63 = vmax.f32 %v1076_v57, 0.0 }
 0x517   : > { %v2762_v58 = vpop.f32.mrf.mxu0 }
 0x518   : > { %v1094_v59 = vmax.f32 %v2762_v58, 0.0 }
 0x519   : > { %v1079_v62 = vpop.f32.mrf.mxu0 }
 0x51a   : > { %v1092_v1 = vmax.f32 %v1079_v62, 0.0  ;;  %v1096_v8 = vpack.c.bf16 %v1094_v59, %v1093_v2 }
 0x51c   : > { %v1095_v4 = vpack.c.bf16 %v1092_v1, %v1091_v63 }
 0x51e   : > { %2765 = vmatprep.mubr.msk.bf16.mxu1 %vm562_vm8, %v1095_v4 }
 0x51f   : > { %2766 = vmatmul.mubr.msk.bf16.vlgmr.msra.gmra.mxu1 %vm562_vm8, %v1096_v8 }
 0x520   : > { %2781 = vmatprep.mubr.msk.bf16.mxu1 %vm3164_vm5, %v3163_v0  ;;  %2770 = vmatpush3.bf16.msra.mxu1 %v2927_v10 }
 0x521   : > { %2771 = vmatprep.subr.bf16.mxu1 %v3163_v0 }
 0x524   : > { %2772 = vmatpush3.bf16.msra.mxu1 %v2928_v12 }
 0x525   : > { %2773 = vmatprep.subr.bf16.mxu1 %v3163_v0 }
 0x528   : > { %2774 = vmatpush3.bf16.msra.mxu1 %v2929_v13 }
 0x529   : > { %2775 = vmatprep.subr.bf16.mxu1 %v3163_v0 }
 0x52c   : > { %2776 = vmatpush3.bf16.msra.mxu1 %v2930_v60 }
 0x52d   : > { %2777 = vmatprep.subr.bf16.mxu1 %v3163_v0 }
 0x530   : > { %2778 = vmatpush3.bf16.msra.mxu1 %v2931_v14 }
 0x531   : > { %2779 = vmatprep.subr.bf16.mxu1 %v3163_v0 }
 0x534   : > { %2780 = vmatpush3.bf16.msra.mxu1 %v2932_v38 }
 0x5df   : > { %v2767_v15 = vpop.f32.mrf.mxu1 }
 0x5e0   : > { %v1163_v55 = vadd.f32 %v2767_v15, %v3441_v3 }
 0x5e1   : > { %v1146_v61 = vpop.f32.mrf.mxu1 }
 0x5e2   : > { %v1173_v16 = vmax.f32 %v1163_v55, 0.0  ;;  %v1161_v17 = vadd.f32 %v1146_v61, %v3444_v5 }
 0x5e3   : > { %v2768_v18 = vpop.f32.mrf.mxu1 }
 0x5e4   : > { %v2664_v19 = vpack.c.bf16 %v1173_v16, %v1173_v16  ;;  %v1171_v56 = vmax.f32 %v1161_v17, 0.0  ;;  %v1164_v20 = vadd.f32 %v2768_v18, %v3447_v6  ;;  %v2933_v18 = vld [vmem:[%s3890_s8 + $0x28] sm:$0xff]  }
 0x5e5   : > { %v1149_v21 = vpop.f32.mrf.mxu1  ;;  %2794 = vmatpush3.bf16.msra.mxu0 %v2933_v18 }
 0x5e6   : > { %v1194_v22 = vrot.slane %v2664_v19, 7  ;;  %v2662_v23 = vpack.c.bf16 %v1171_v56, %v1171_v56  ;;  %v1174_v24 = vmax.f32 %v1164_v20, 0.0  ;;  %v1162_v25 = vadd.f32 %v1149_v21, %v3452_v11  ;;  %v2934_v19 = vld [vmem:[%s3890_s8 + $0x20] sm:$0xff]   ;;  %2795 = vmatprep.subr.bf16.mxu0 %v3163_v0  ;;  %v2935_v56 = vld [vmem:[%s3890_s8 + $0x18] sm:$0xff]   ;;  %v2936_v20 = vld [vmem:[%s3890_s8 + $0x10] sm:$0xff]  }
 0x5e7   : > { %v2937_v21 = vld [vmem:[%s3890_s8 + $0x8] sm:$0xff]  }
 0x5e8   : > { %v1189_v26 = vrot.slane %v2662_v23, 7  ;;  %v2665_v27 = vpack.c.bf16 %v1174_v24, %v1174_v24  ;;  %v1172_v3 = vmax.f32 %v1162_v25, 0.0  ;;  %v1196_v5 = vrot.slane %v1194_v22, 4 }
 0x5e9   : > { %2796 = vmatpush3.bf16.msra.mxu0 %v2934_v19  ;;  %v1417_v25 = vadd.s32 4294967295, %v3370_v33 }
 0x5ea   : > { %1206 = vst.msk [vmem:[#allocation3] sm:$0xe] %vm1205_vm2, %v1189_v26  ;;  %v1197_v29 = vrot.slane %v2665_v27, 7  ;;  %v2663_v6 = vpack.c.bf16 %v1172_v3, %v1172_v3  ;;  %v1190_v30 = vrot.slane %v1189_v26, 4  ;;  %2797 = vmatprep.subr.bf16.mxu0 %v3163_v0 }
 0x5eb   : > { %vm1422_vm1 = vcmp.ge.s32.totalorder %v1417_v25, 0 }
 0x5ec   : > { %v1198_v31 = vsel %vm3524_vm3, %v1196_v5, %v1197_v29  ;;  %v1199_v32 = vrot.slane %v1197_v29, 4  ;;  %v1191_v11 = vrot.slane %v2663_v6, 7 }
 0x5ed   : > { %1209 = vst.msk [vmem:[#allocation3 + $0xc] sm:$0xf] %vm1165_vm15, %v1198_v31  ;;  %2798 = vmatpush3.bf16.msra.mxu0 %v2935_v56  ;;  %v2938_v31 = vld [vmem:[%s3890_s8] sm:$0xff]  }
 0x5ee   : > { %1211 = vst.msk [vmem:[#allocation3 + $0x10] sm:$0x1] %vm1210_vm7, %v1199_v32  ;;  %v1192_v35 = vsel %vm3524_vm3, %v1190_v30, %v1191_v11  ;;  %v1193_v37 = vrot.slane %v1191_v11, 4  ;;  %2799 = vmatprep.subr.bf16.mxu0 %v3163_v0 }
 0x5ef   : > { %1207 = vst.msk [vmem:[#allocation3 + $0x4] sm:$0xf] %vm1165_vm15, %v1192_v35  ;;  %v1415_v35 = vadd.s32 32, %v3370_v33 }
 0x5f0   : > { %v1195_v40 = vsel %vm3524_vm3, %v1193_v37, %v1194_v22  ;;  %v2574_v22 = vld [vmem:[#allocation6] ss:$0 sm:$0xff] }
 0x5f1   : > { %1208 = vst.msk [vmem:[#allocation3 + $0x8] sm:$0xf] %vm1165_vm15, %v1195_v40  ;;  %2800 = vmatpush3.bf16.msra.mxu0 %v2936_v20 }
 0x5f2   : > { %2801 = vmatprep.subr.bf16.mxu0 %v3163_v0 }
 0x5f5   : > { %v2926_v42 = vld [vmem:[#allocation3 + $0x10] ss:$0 sps:$4 sm:$0x77]   ;;  %2802 = vmatpush3.bf16.msra.mxu0 %v2937_v21 }
 0x5f6   : > { %v2924_v41 = vld [vmem:[#allocation3] sm:$0xff]   ;;  %v1265_v49 = vshll.u32 %v2926_v42, 16  ;;  %v1282_v57 = vrot.slane %v2926_v42, 1  ;;  %v1269_v1 = vshrl.u32 %v2926_v42, 16  ;;  %2803 = vmatprep.subr.bf16.mxu0 %v3163_v0 }
 0x5f7   : > { %v1252_v43 = vshll.u32 %v2924_v41, 16  ;;  %v1279_v44 = vrot.slane %v2924_v41, 1  ;;  %v1250_v46 = vshrl.u32 %v2924_v41, 16 }
 0x5f8   : > { %v2925_v7 = vld [vmem:[#allocation3 + $0x8] sm:$0xff]   ;;  %v1267_v62 = vrot.slane %v1265_v49, 1 }
 0x5f9   : > { %v1280_v45 = vrot.slane %v2925_v7, 1  ;;  %v1254_v47 = vrot.slane %v1252_v43, 1  ;;  %v1257_v48 = vshll.u32 %v2925_v7, 16  ;;  %v1261_v53 = vshrl.u32 %v2925_v7, 16  ;;  %2804 = vmatpush3.bf16.msra.mxu0 %v2938_v31  ;;  %v2953_v31 = vld [vmem:[%s3892_s10 + $0xdc] ss:$36 sps:$4 sm:$0xff]  }
 0x5fa   : > { %v1271_v2 = vor.u32 %v1269_v1, %v1267_v62 }
 0x5fb   : > { %v1281_v50 = vsel %vm553_vm6, %v1279_v44, %v1280_v45  ;;  %v1255_v51 = vor.u32 %v1254_v47, %v1250_v46  ;;  %v1259_v52 = vrot.slane %v1257_v48, 1  ;;  %v1283_v59 = vsel %vm553_vm6, %v1280_v45, %v1282_v57 }
 0x5fc   : > { %1284 = vrot.lane.b32.xlu1 %v1281_v50, %s3167_s28 }
 0x5fd   : > { %v1260_v54 = vsel %vm536_vm4, %v1255_v51, %v1259_v52  ;;  %v1263_v58 = vor.u32 %v1261_v53, %v1259_v52 }
 0x5fe   : > { %1272 = vrot.lane.b32.xlu0 %v1260_v54, %s3168_s30 }
 0x5ff   : > { %v1268_v63 = vsel %vm536_vm4, %v1263_v58, %v1267_v62 }
 0x600   : > { %1286 = vrot.lane.b32.xlu1 %v1283_v59, %s3167_s28 }
 0x602   : > { %1274 = vrot.lane.b32.xlu0 %v1268_v63, %s3168_s30 }
 0x604   : > { %1288 = vrot.lane.b32.xlu1 %v1282_v57, %s3167_s28 }
 0x606   : > { %1276 = vrot.lane.b32.xlu0 %v1271_v2, %s3168_s30 }
 0x66e   : > { %v1285_v8 = vpop.permute.xlu1 %1284 }
 0x670   : > { %v1273_v4 = vpop.permute.xlu0 %1272 }
 0x671   : > { %v1292_v10 = vsel %vm748_vm12, %v2924_v41, %v1273_v4 }
 0x672   : > { %v1299_v12 = vsel %vm753_vm13, %v1292_v10, %v1285_v8  ;;  %v1287_v14 = vpop.permute.xlu1 %1286 }
 0x673   : > { %2782 = vmatmul.mubr.msk.bf16.vlgmr.msra.gmra.mxu1 %vm794_vm14, %v1299_v12 }
 0x674   : > { %v1275_v13 = vpop.permute.xlu0 %1274  ;;  %2785 = vmatprep.mubr.msk.bf16.mxu1 %vm3164_vm5, %v3163_v0 }
 0x675   : > { %v1294_v60 = vsel %vm748_vm12, %v2925_v7, %v1275_v13  ;;  %v1421_v7 = vadd.s32 4294967295, %v1415_v35  ;;  %v2954_v35 = vld [vmem:[%s3892_s10 + $0xe0] ss:$36 sps:$4 sm:$0xff]  }
 0x676   : > { %v1301_v15 = vsel %vm753_vm13, %v1294_v60, %v1287_v14  ;;  %v1289_v16 = vpop.permute.xlu1 %1288 }
 0x677   : > { %vm1431_vm8 = vcmp.lt.s32.totalorder %v1421_v7, 32  ;;  %v2968_v7 = vld [vmem:[%s3892_s10 + $0x54] ss:$36 sps:$4 sm:$0xff]  }
 0x678   : > { %v1277_v55 = vpop.permute.xlu0 %1276 }
 0x679   : > { %v1296_v61 = vsel %vm748_vm12, %v2926_v42, %v1277_v55 }
 0x67a   : > { %v1303_v17 = vsel %vm753_vm13, %v1296_v61, %v1289_v16 }
 0x67b   : > { %2786 = vmatmul.mubr.msk.bf16.gmra.mxu1 %vm794_vm14, %v1301_v15 }
 0x67c   : > { %2789 = vmatprep.mubr.msk.bf16.mxu1 %vm3164_vm5, %v3163_v0 }
 0x683   : > { %2790 = vmatmul.mubr.msk.bf16.gmra.mxu1 %vm794_vm14, %v1303_v17 }
 0x684   : > { %2105 = vmatprep.mubr.bf16.mxu1 %v3169_v9 }
 0x733   : > { %v1387_v23 = vpop.f32.mrf.mxu1 }
 0x734   : > { %v1388_v24 = vadd.f32 %v2574_v22, %v1387_v23 }
 0x735   : > { %v2783_v26 = vpop.f32.mrf.mxu1 }
 0x736   : > { %v1437_v27 = vmax.f32 %v1388_v24, 0.0 }
 0x737   : > { %v1390_v3 = vpop.f32.mrf.mxu1 }
 0x738   : > { %v1391_v28 = vadd.f32 %v2574_v22, %v1390_v3  ;;  %v1452_v6 = vsel %vm1422_vm1, %v1437_v27, 0.0  ;;  %v2939_v27 = vld [vmem:[%s3892_s10 + $0x168] ss:$36 sps:$4 sm:$0xff]  }
 0x739   : > { %v2784_v5 = vpop.f32.mrf.mxu1  ;;  %v2941_v3 = vld [vmem:[%s3892_s10 + $0x16c] ss:$36 sps:$4 sm:$0xff]  }
 0x73a   : > { %v1438_v29 = vmax.f32 %v1391_v28, 0.0  ;;  %v2944_v28 = vld [vmem:[%s3892_s10 + $0x174] ss:$36 sps:$4 sm:$0xff]   ;;  %v2947_v5 = vld [vmem:[%s3892_s10 + $0x124] ss:$36 sps:$4 sm:$0xff]   ;;  %2077 = vmatprep.subr.bf16.mxu1 %v2941_v3 }
 0x73b   : > { %v1395_v30 = vpop.f32.mrf.mxu1  ;;  %2130 = vmatprep.subr.bf16.mxu0 %v2944_v28  ;;  %2078 = vmatpush1.bf16.msra.mxu1 %v2939_v27 }
 0x73c   : > { %v1457_v32 = vpack.c.bf16 %v1438_v29, %v1452_v6  ;;  %v1396_v37 = vadd.f32 %v2574_v22, %v1395_v30  ;;  %v2950_v29 = vld [vmem:[%s3892_s10 + $0x12c] ss:$36 sps:$4 sm:$0xff]   ;;  %v2945_v6 = vld [vmem:[%s3892_s10 + $0x120] ss:$36 sps:$4 sm:$0xff]   ;;  %2079 = vmatprep.subr.bf16.mxu1 %v2947_v5 }
 0x73d   : > { %v2787_v11 = vpop.f32.mrf.mxu1  ;;  %v2948_v30 = vld [vmem:[%s3892_s10 + $0x128] ss:$36 sps:$4 sm:$0xff]  }
 0x73e   : > { %v1476_v41 = vshll.u32 %v1457_v32, 16  ;;  %v1439_v43 = vmax.f32 %v1396_v37, 0.0  ;;  %v1505_v50 = vrot.slane %v1457_v32, 1  ;;  %v1474_v53 = vshrl.u32 %v1457_v32, 16  ;;  %v2951_v11 = vld [vmem:[%s3892_s10 + $0xd8] ss:$36 sps:$4 sm:$0xff]  }
 0x73f   : > { %v1398_v38 = vpop.f32.mrf.mxu1  ;;  %2080 = vmatpush1.bf16.msra.mxu1 %v2945_v6  ;;  %v2959_v37 = vld [vmem:[%s3892_s10 + $0x94] ss:$36 sps:$4 sm:$0xff]  }
 0x740   : > { %v1399_v40 = vadd.f32 %v2574_v22, %v1398_v38  ;;  %v1478_v48 = vrot.slane %v1476_v41, 1  ;;  %2081 = vmatprep.subr.bf16.mxu1 %v2953_v31  ;;  %v2962_v38 = vld [vmem:[%s3892_s10 + $0x9c] ss:$36 sps:$4 sm:$0xff]  }
 0x741   : > { %v2788_v42 = vpop.f32.mrf.mxu1  ;;  %v2960_v41 = vld [vmem:[%s3892_s10 + $0x98] ss:$36 sps:$4 sm:$0xff]  }
 0x742   : > { %v1440_v44 = vmax.f32 %v1399_v40, 0.0  ;;  %v1479_v62 = vor.u32 %v1478_v48, %v1474_v53  ;;  %v2957_v40 = vld [vmem:[%s3892_s10 + $0x90] ss:$36 sps:$4 sm:$0xff]   ;;  %v2972_v48 = vld [vmem:[%s3892_s10 + $0x8] ss:$36 sps:$4 sm:$0xff]  }
 0x743   : > { %v1403_v45 = vpop.f32.mrf.mxu1  ;;  %2082 = vmatpush1.bf16.msra.mxu1 %v2951_v11  ;;  %v2965_v42 = vld [vmem:[%s3892_s10 + $0x4c] ss:$36 sps:$4 sm:$0xff]  }
 0x744   : > { %v1458_v46 = vpack.c.bf16 %v1440_v44, %v1439_v43  ;;  %v1404_v47 = vadd.f32 %v2574_v22, %v1403_v45  ;;  %2083 = vmatprep.subr.bf16.mxu1 %v2959_v37  ;;  %v2963_v43 = vld [vmem:[%s3892_s10 + $0x48] ss:$36 sps:$4 sm:$0xff]   ;;  %v2966_v44 = vld [vmem:[%s3892_s10 + $0x50] ss:$36 sps:$4 sm:$0xff]   ;;  %v2978_v37 = vld [vmem:[%s3892_s10 + $0x180] ss:$36 sps:$4 sm:$0xff]  }
 0x745   : > { %v2791_v49 = vpop.f32.mrf.mxu1  ;;  %v2971_v45 = vld [vmem:[%s3892_s10 + $0x4] ss:$36 sps:$4 sm:$0xff]  }
 0x746   : > { %v1441_v51 = vmax.f32 %v1404_v47, 0.0  ;;  %v1506_v52 = vrot.slane %v1458_v46, 1  ;;  %v1481_v54 = vshll.u32 %v1458_v46, 16  ;;  %v1485_v10 = vshrl.u32 %v1458_v46, 16  ;;  %v2969_v47 = vld [vmem:[%s3892_s10] ss:$36 sps:$4 sm:$0xff]  }
 0x747   : > { %v1406_v57 = vpop.f32.mrf.mxu1  ;;  %2084 = vmatpush1.bf16.msra.mxu1 %v2957_v40  ;;  %v2584_v49 = vld [vmem:[#allocation8] ss:$0 sm:$0xff] }
 0x748   : > { %v1456_v58 = vsel %vm1431_vm8, %v1441_v51, 0.0  ;;  %v1507_v59 = vsel %vm553_vm6, %v1505_v50, %v1506_v52  ;;  %v1483_v63 = vrot.slane %v1481_v54, 1  ;;  %2085 = vmatprep.subr.bf16.mxu1 %v2965_v42  ;;  %v2986_v42 = vld [vmem:[%s3892_s10 + $0x13c] ss:$36 sps:$4 sm:$0xff]  }
 0x749   : > { %v1459_v1 = vpack.c.bf16 %v1456_v58, %v1456_v58  ;;  %1510 = vrot.lane.b32.xlu1 %v1507_v59, %s3167_s28  ;;  %v2792_v2 = vpop.f32.mrf.mxu1 }
 0x74a   : > { %v1484_v4 = vsel %vm536_vm4, %v1479_v62, %v1483_v63  ;;  %v1487_v60 = vor.u32 %v1485_v10, %v1483_v63  ;;  %v2980_v10 = vld [vmem:[%s3892_s10 + $0x184] ss:$36 sps:$4 sm:$0xff]  }
 0x74b   : > { %1496 = vrot.lane.b32.xlu0 %v1484_v4, %s3168_s30  ;;  %v1508_v8 = vrot.slane %v1459_v1, 1  ;;  %v1489_v12 = vshll.u32 %v1459_v1, 16  ;;  %v1493_v55 = vshrl.u32 %v1459_v1, 16  ;;  %2086 = vmatpush1.bf16.msra.mxu1 %v2963_v43  ;;  %v2977_v4 = vld [vmem:[%s3892_s10 + $0x17c] ss:$36 sps:$4 sm:$0xff]  }
 0x74c   : > { %2087 = vmatprep.subr.bf16.mxu1 %v2971_v45  ;;  %v2984_v45 = vld [vmem:[%s3892_s10 + $0x138] ss:$36 sps:$4 sm:$0xff]  }
 0x74d   : > { %v1509_v13 = vsel %vm553_vm6, %v1506_v52, %v1508_v8  ;;  %v1491_v14 = vrot.slane %v1489_v12, 1 }
 0x74e   : > { %1512 = vrot.lane.b32.xlu1 %v1509_v13, %s3167_s28 }
 0x74f   : > { %v1492_v15 = vsel %vm536_vm4, %v1487_v60, %v1491_v14  ;;  %v1495_v61 = vor.u32 %v1493_v55, %v1491_v14  ;;  %2088 = vmatpush1.bf16.msra.mxu1 %v2969_v47  ;;  %v2992_v47 = vld [vmem:[%s3892_s10 + $0xf4] ss:$36 sps:$4 sm:$0xff]  }
 0x750   : > { %1498 = vrot.lane.b32.xlu0 %v1492_v15, %s3168_s30  ;;  %2183 = vmatprep.subr.bf16.mxu1 %v2977_v4  ;;  %v3010_v4 = vld [vmem:[%s3892_s10 + $0x1c] ss:$36 sps:$4 sm:$0xff]  }
 0x752   : > { %1514 = vrot.lane.b32.xlu1 %v1508_v8, %s3167_s28 }
 0x754   : > { %1500 = vrot.lane.b32.xlu0 %v1495_v61, %s3168_s30 }
 0x7bb   : > { %v1511_v17 = vpop.permute.xlu1 %1510 }
 0x7bd   : > { %v1497_v16 = vpop.permute.xlu0 %1496 }
 0x7be   : > { %v1517_v18 = vsel %vm748_vm12, %v1457_v32, %v1497_v16  ;;  %v2956_v32 = vld [vmem:[%s3892_s10 + $0xe4] ss:$36 sps:$4 sm:$0xff]  }
 0x7bf   : > { %v1523_v19 = vsel %vm753_vm13, %v1517_v18, %v1511_v17 }
 0x7c0   : > { %2806 = vmatmul.mubr.msk.bf16.vlgmr.msra.gmra.mxu0 %vm794_vm14, %v1523_v19  ;;  %v1513_v21 = vpop.permute.xlu1 %1512 }
 0x7c1   : > { %2809 = vmatprep.mubr.msk.bf16.mxu0 %vm3164_vm5, %v3163_v0 }
 0x7c2   : > { %v1499_v56 = vpop.permute.xlu0 %1498 }
 0x7c3   : > { %v1519_v20 = vsel %vm748_vm12, %v1458_v46, %v1499_v56  ;;  %v2974_v46 = vld [vmem:[%s3892_s10 + $0xc] ss:$36 sps:$4 sm:$0xff]  }
 0x7c4   : > { %v1525_v22 = vsel %vm753_vm13, %v1519_v20, %v1513_v21  ;;  %v1515_v25 = vpop.permute.xlu1 %1514 }
 0x7c6   : > { %v1501_v23 = vpop.permute.xlu0 %1500 }
 0x7c7   : > { %v1521_v24 = vsel %vm748_vm12, %v1459_v1, %v1501_v23 }
 0x7c8   : > { %2810 = vmatmul.mubr.msk.bf16.gmra.mxu0 %vm794_vm14, %v1525_v22  ;;  %v1527_v26 = vsel %vm753_vm13, %v1521_v24, %v1515_v25 }
 0x7c9   : > { %2813 = vmatprep.mubr.msk.bf16.mxu0 %vm3164_vm5, %v3163_v0  ;;  %v2942_v0 = vld [vmem:[%s3892_s10 + $0x170] ss:$36 sps:$4 sm:$0xff]  }
 0x7ca   : > { %2131 = vmatpush1.bf16.msra.mxu0 %v2942_v0 }
 0x7cb   : > { %2132 = vmatprep.subr.bf16.mxu0 %v2950_v29 }
 0x7ce   : > { %2133 = vmatpush1.bf16.msra.mxu0 %v2948_v30 }
 0x7cf   : > { %2134 = vmatprep.subr.bf16.mxu0 %v2956_v32 }
 0x7d0   : > { %2814 = vmatmul.mubr.msk.bf16.gmra.mxu0 %vm794_vm14, %v1527_v26 }
 0x7d1   : > { %2158 = vmatprep.mubr.bf16.mxu0 %v3169_v9 }
 0x7d2   : > { %2135 = vmatpush1.bf16.msra.mxu0 %v2954_v35  ;;  %v2975_v35 = vld [vmem:[%s3892_s10 + $0x178] ss:$36 sps:$4 sm:$0xff]  }
 0x7d3   : > { %2136 = vmatprep.subr.bf16.mxu0 %v2962_v38 }
 0x7d6   : > { %2137 = vmatpush1.bf16.msra.mxu0 %v2960_v41  ;;  %v2983_v41 = vld [vmem:[%s3892_s10 + $0x134] ss:$36 sps:$4 sm:$0xff]  }
 0x7d7   : > { %2138 = vmatprep.subr.bf16.mxu0 %v2968_v7 }
 0x7da   : > { %2139 = vmatpush1.bf16.msra.mxu0 %v2966_v44  ;;  %v2981_v44 = vld [vmem:[%s3892_s10 + $0x130] ss:$36 sps:$4 sm:$0xff]  }
 0x7db   : > { %2140 = vmatprep.subr.bf16.mxu0 %v2974_v46  ;;  %v2989_v46 = vld [vmem:[%s3892_s10 + $0xec] ss:$36 sps:$4 sm:$0xff]  }
 0x7de   : > { %2141 = vmatpush1.bf16.msra.mxu0 %v2972_v48 }
 0x7df   : > { %2236 = vmatprep.subr.bf16.mxu0 %v2980_v10  ;;  %v3008_v10 = vld [vmem:[%s3892_s10 + $0x18] ss:$36 sps:$4 sm:$0xff]  }
 0x880   : > { %v1610_v50 = vpop.f32.mrf.mxu0 }
 0x881   : > { %v1611_v52 = vadd.f32 %v2584_v49, %v1610_v50  ;;  %v2990_v50 = vld [vmem:[%s3892_s10 + $0xf0] ss:$36 sps:$4 sm:$0xff]  }
 0x882   : > { %v2807_v51 = vpop.f32.mrf.mxu0 }
 0x883   : > { %v1632_v58 = vmax.f32 %v1611_v52, 0.0  ;;  %v2995_v52 = vld [vmem:[%s3892_s10 + $0xa4] ss:$36 sps:$4 sm:$0xff]  }
 0x884   : > { %v1613_v53 = vpop.f32.mrf.mxu0 }
 0x885   : > { %v1614_v54 = vadd.f32 %v2584_v49, %v1613_v53  ;;  %v2998_v53 = vld [vmem:[%s3892_s10 + $0xac] ss:$36 sps:$4 sm:$0xff]  }
 0x886   : > { %v2808_v57 = vpop.f32.mrf.mxu0 }
 0x887   : > { %v1633_v59 = vmax.f32 %v1614_v54, 0.0  ;;  %v2993_v57 = vld [vmem:[%s3892_s10 + $0xa0] ss:$36 sps:$4 sm:$0xff]  }
 0x888   : > { %v1618_v62 = vpop.f32.mrf.mxu0 }
 0x889   : > { %v1637_v63 = vpack.c.bf16 %v1633_v59, %v1632_v58  ;;  %v1619_v2 = vadd.f32 %v2584_v49, %v1618_v62  ;;  %v2996_v58 = vld [vmem:[%s3892_s10 + $0xa8] ss:$36 sps:$4 sm:$0xff]   ;;  %v3001_v59 = vld [vmem:[%s3892_s10 + $0x5c] ss:$36 sps:$4 sm:$0xff]  }
 0x88a   : > { %v2811_v1 = vpop.f32.mrf.mxu0  ;;  %v3004_v62 = vld [vmem:[%s3892_s10 + $0x64] ss:$36 sps:$4 sm:$0xff]  }
 0x88b   : > { %v1705_v13 = vshll.u32 %v1637_v63, 16  ;;  %v1634_v14 = vmax.f32 %v1619_v2, 0.0  ;;  %v1729_v19 = vrot.slane %v1637_v63, 1  ;;  %v1703_v21 = vshrl.u32 %v1637_v63, 16  ;;  %v3002_v1 = vld [vmem:[%s3892_s10 + $0x60] ss:$36 sps:$4 sm:$0xff]  }
 0x88c   : > { %v1621_v8 = vpop.f32.mrf.mxu0  ;;  %v3007_v2 = vld [vmem:[%s3892_s10 + $0x14] ss:$36 sps:$4 sm:$0xff]  }
 0x88d   : > { %v1622_v12 = vadd.f32 %v2584_v49, %v1621_v8  ;;  %v1707_v17 = vrot.slane %v1705_v13, 1  ;;  %v3005_v8 = vld [vmem:[%s3892_s10 + $0x10] ss:$36 sps:$4 sm:$0xff]   ;;  %v3012_v13 = vld [vmem:[%s3892_s10 + $0x140] ss:$36 sps:$4 sm:$0xff]  }
 0x88e   : > { %v2812_v60 = vpop.f32.mrf.mxu0 }
 0x88f   : > { %v1635_v15 = vmax.f32 %v1622_v12, 0.0  ;;  %v1708_v26 = vor.u32 %v1707_v17, %v1703_v21  ;;  %v3011_v12 = vld [vmem:[%s3892_s10 + $0x188] ss:$36 sps:$4 sm:$0xff]   ;;  %v3013_v60 = vld [vmem:[%s3892_s10 + $0xf8] ss:$36 sps:$4 sm:$0xff]  }
 0x890   : > { %v1626_v55 = vpop.f32.mrf.mxu0 }
 0x891   : > { %v1638_v61 = vpack.c.bf16 %v1635_v15, %v1634_v14  ;;  %v1627_v16 = vadd.f32 %v2584_v49, %v1626_v55  ;;  %v2987_v49 = vld [vmem:[%s3892_s10 + $0xe8] ss:$36 sps:$4 sm:$0xff]   ;;  %v3014_v14 = vld [vmem:[%s3892_s10 + $0xb0] ss:$36 sps:$4 sm:$0xff]   ;;  %v3016_v15 = vld [vmem:[%s3892_s10 + $0x20] ss:$36 sps:$4 sm:$0xff]  }
 0x892   : > { %v2815_v18 = vpop.f32.mrf.mxu0  ;;  %v3810_v55 = vld [vmem:[#allocation9] sm:$0xff] }
 0x893   : > { %v1636_v56 = vmax.f32 %v1627_v16, 0.0  ;;  %v1730_v20 = vrot.slane %v1638_v61, 1  ;;  %v1710_v22 = vshll.u32 %v1638_v61, 16  ;;  %v1714_v29 = vshrl.u32 %v1638_v61, 16 }
 0x894   : > { %v1629_v23 = vpop.f32.mrf.mxu0  ;;  %v1751_v16 = vrot.slane %v3810_v55, %v633_v36  ;;  %v1759_v17 = vrot.slane %v3810_v55, %v659_v39  ;;  %v1755_v18 = vrot.slane %v3810_v55, %v645_v34 }
 0x895   : > { %v1639_v24 = vpack.c.bf16 %v1636_v56, %v1636_v56  ;;  %v1731_v25 = vsel %vm553_vm6, %v1729_v19, %v1730_v20  ;;  %v1712_v27 = vrot.slane %v1710_v22, 1 }
 0x896   : > { %1734 = vrot.lane.b32.xlu1 %v1731_v25, %s3167_s28  ;;  %v2816_v3 = vpop.f32.mrf.mxu0 }
 0x897   : > { %v1718_v0 = vshll.u32 %v1639_v24, 16  ;;  %v1732_v28 = vrot.slane %v1639_v24, 1  ;;  %v1713_v5 = vsel %vm536_vm4, %v1708_v26, %v1712_v27  ;;  %v1716_v31 = vor.u32 %v1714_v29, %v1712_v27 }
 0x898   : > { %1722 = vrot.lane.b32.xlu0 %v1713_v5, %s3168_s30 }
 0x899   : > { %v1720_v6 = vrot.slane %v1718_v0, 1  ;;  %v1733_v30 = vsel %vm553_vm6, %v1730_v20, %v1732_v28 }
 0x89a   : > { %1736 = vrot.lane.b32.xlu1 %v1733_v30, %s3167_s28 }
 0x89b   : > { %v1721_v32 = vsel %vm536_vm4, %v1716_v31, %v1720_v6 }
 0x89c   : > { %1724 = vrot.lane.b32.xlu0 %v1721_v32, %s3168_s30 }
 0x908   : > { %v1735_v38 = vpop.permute.xlu1 %1734 }
 0x90a   : > { %v1723_v11 = vpop.permute.xlu0 %1722 }
 0x90b   : > { %v1739_v40 = vsel %vm748_vm12, %v1637_v63, %v1723_v11  ;;  %v2999_v63 = vld [vmem:[%s3892_s10 + $0x58] ss:$36 sps:$4 sm:$0xff]  }
 0x90c   : > { %v3713_v7 = vsel %vm753_vm13, %v1739_v40, %v1735_v38  ;;  %v1737_v51 = vpop.permute.xlu1 %1736 }
 0x90d   : > { %2649 = vmatmul.mubr.msk.bf16.vlgmr.msra.gmra.mxu1 %vm794_vm14, %v3713_v7  ;;  %2651 = vmatmul.mubr.msk.bf16.vlgmr.msra.gmra.mxu0 %vm794_vm14, %v3713_v7 }
 0x90e   : > { %2184 = vmatpush1.bf16.msra.mxu1 %v2975_v35  ;;  %2237 = vmatpush1.bf16.msra.mxu0 %v2978_v37  ;;  %v1725_v43 = vpop.permute.xlu0 %1724 }
 0x90f   : > { %2185 = vmatprep.subr.bf16.mxu1 %v2983_v41  ;;  %2238 = vmatprep.subr.bf16.mxu0 %v2986_v42  ;;  %v1741_v48 = vsel %vm748_vm12, %v1638_v61, %v1725_v43  ;;  %v1762_v61 = vsub.s32 3, %v3370_v33 }
 0x910   : > { %2115 = vmatprep.mubr.bf16.mxu1 %v3169_v9  ;;  %2168 = vmatprep.mubr.bf16.mxu0 %v3169_v9  ;;  %v1745_v54 = vsel %vm753_vm13, %v1741_v48, %v1737_v51  ;;  %v1770_v48 = vsub.s32 5, %v3370_v33 }
 0x911   : > { %v1763_v19 = vrot.slane %v3810_v55, %v1762_v61 }
 0x912   : > { %2186 = vmatpush1.bf16.msra.mxu1 %v2981_v44  ;;  %2239 = vmatpush1.bf16.msra.mxu0 %v2984_v45 }
 0x913   : > { %2187 = vmatprep.subr.bf16.mxu1 %v2989_v46  ;;  %2240 = vmatprep.subr.bf16.mxu0 %v2992_v47  ;;  %v1766_v46 = vsub.s32 4, %v3370_v33  ;;  %v1774_v47 = vsub.s32 6, %v3370_v33 }
 0x915   : > { %2650 = vmatmul.mubr.msk.bf16.gmra.mxu1 %vm794_vm14, %v1745_v54  ;;  %2652 = vmatmul.mubr.msk.bf16.gmra.mxu0 %vm794_vm14, %v1745_v54  ;;  %v1775_v51 = vrot.slane %v3810_v55, %v1774_v47 }
 0x916   : > { %2188 = vmatpush1.bf16.msra.mxu1 %v2987_v49  ;;  %2241 = vmatpush1.bf16.msra.mxu0 %v2990_v50  ;;  %v1778_v49 = vsub.s32 7, %v3370_v33  ;;  %v1767_v50 = vrot.slane %v3810_v55, %v1766_v46 }
 0x917   : > { %2189 = vmatprep.subr.bf16.mxu1 %v2995_v52  ;;  %2242 = vmatprep.subr.bf16.mxu0 %v2998_v53  ;;  %v1771_v52 = vrot.slane %v3810_v55, %v1770_v48 }
 0x918   : > { %2211 = vmatprep.mubr.bf16.mxu1 %v3169_v9  ;;  %2264 = vmatprep.mubr.bf16.mxu0 %v3169_v9  ;;  %v1779_v53 = vrot.slane %v3810_v55, %v1778_v49 }
 0x91a   : > { %2190 = vmatpush1.bf16.msra.mxu1 %v2993_v57  ;;  %2243 = vmatpush1.bf16.msra.mxu0 %v2996_v58 }
 0x91b   : > { %2191 = vmatprep.subr.bf16.mxu1 %v3001_v59  ;;  %2244 = vmatprep.subr.bf16.mxu0 %v3004_v62 }
 0x91e   : > { %2192 = vmatpush1.bf16.msra.mxu1 %v2999_v63  ;;  %2245 = vmatpush1.bf16.msra.mxu0 %v3002_v1 }
 0x91f   : > { %2193 = vmatprep.subr.bf16.mxu1 %v3007_v2  ;;  %2246 = vmatprep.subr.bf16.mxu0 %v3010_v4 }
 0x922   : > { %2194 = vmatpush1.bf16.msra.mxu1 %v3005_v8  ;;  %2247 = vmatpush1.bf16.msra.mxu0 %v3008_v10 }
 0x923   : > { %2817 = vmatprep.subr.bf16.mxu1 %v3011_v12 }
 0x925   : > { %2653 = vmatmul.mubr.msk.bf16.vlgmr.msra.gmra.mxu1 %vm794_vm14, %v3713_v7  ;;  %2655 = vmatmul.mubr.msk.bf16.vlgmr.msra.gmra.mxu0 %vm794_vm14, %v3713_v7 }
 0x926   : > { %2818 = vmatpush3.bf16.msra.mxu1 %v3011_v12  ;;  %2221 = vmatprep.mubr.bf16.mxu1 %v3169_v9 }
 0x927   : > { %2819 = vmatprep.subr.bf16.mxu1 %v3012_v13  ;;  %2274 = vmatprep.mubr.bf16.mxu0 %v3169_v9  ;;  %v3015_v9 = vld [vmem:[%s3892_s10 + $0x68] ss:$36 sps:$4 sm:$0xff]  }
 0x92a   : > { %2820 = vmatpush3.bf16.msra.mxu1 %v3012_v13 }
 0x92b   : > { %2821 = vmatprep.subr.bf16.mxu1 %v3013_v60 }
 0x92d   : > { %2654 = vmatmul.mubr.msk.bf16.gmra.mxu1 %vm794_vm14, %v1745_v54  ;;  %2656 = vmatmul.mubr.msk.bf16.gmra.mxu0 %vm794_vm14, %v1745_v54 }
 0x92e   : > { %2822 = vmatpush3.bf16.msra.mxu1 %v3013_v60  ;;  %2829 = vmatprep.mubr.msk.bf16.mxu1 %vm794_vm14, %v3713_v7 }
 0x92f   : > { %2823 = vmatprep.subr.bf16.mxu1 %v3014_v14 }
 0x932   : > { %2824 = vmatpush3.bf16.msra.mxu1 %v3014_v14 }
 0x933   : > { %2825 = vmatprep.subr.bf16.mxu1 %v3015_v9 }
 0x936   : > { %2826 = vmatpush3.bf16.msra.mxu1 %v3015_v9 }
 0x937   : > { %2827 = vmatprep.subr.bf16.mxu1 %v3016_v15 }
 0x93a   : > { %2828 = vmatpush3.bf16.msra.mxu1 %v3016_v15 }
 0x93d   : > { %2830 = vmatmul.mubr.msk.bf16.vlgmr.msra.gmra.mxu1 %vm794_vm14, %v1745_v54 }
 0x9cd   : > { %v2107_v36 = vpop.f32.mrf.mxu1  ;;  %v2160_v56 = vpop.f32.mrf.mxu0 }
 0x9ce   : > { %v2108_v20 = vadd.f32 %v2107_v36, %v1751_v16  ;;  %v2161_v39 = vadd.f32 %v2160_v56, %v1759_v17 }
 0x9cf   : > { %v2109_v21 = vpop.f32.mrf.mxu1  ;;  %v2162_v22 = vpop.f32.mrf.mxu0 }
 0x9d0   : > { %2334 = vst [vmem:[%s3827_s24] sm:$0xff] %v2108_v20  ;;  %2336 = vst [vmem:[%s3827_s24 + $0x10] sm:$0xff] %v2161_v39  ;;  %v2110_v34 = vadd.f32 %v2109_v21, %v1755_v18  ;;  %v2163_v23 = vadd.f32 %v2162_v22, %v1763_v19 }
 0x9d1   : > { %v2111_v24 = vpop.f32.mrf.mxu1  ;;  %v2164_v25 = vpop.f32.mrf.mxu0 }
 0x9d2   : > { %2335 = vst [vmem:[%s3827_s24 + $0x8] sm:$0xff] %v2110_v34  ;;  %2337 = vst [vmem:[%s3827_s24 + $0x18] sm:$0xff] %v2163_v23  ;;  %v2112_v26 = vadd.f32 %v2111_v24, %v1751_v16  ;;  %v2165_v27 = vadd.f32 %v2164_v25, %v1759_v17  ;;  %v2594_v24 = vld [vmem:[#allocation9 + $0x8] ss:$0 sm:$0xff] }
 0x9d3   : > { %v2113_v3 = vpop.f32.mrf.mxu1  ;;  %v2166_v0 = vpop.f32.mrf.mxu0 }
 0x9d4   : > { %2343 = vst [vmem:[%s3827_s24 + $0x48] sm:$0xff] %v2112_v26  ;;  %2345 = vst [vmem:[%s3827_s24 + $0x58] sm:$0xff] %v2165_v27  ;;  %v2114_v28 = vadd.f32 %v2113_v3, %v1755_v18  ;;  %v2167_v5 = vadd.f32 %v2166_v0, %v1763_v19 }
 0x9d5   : > { %v2117_v29 = vpop.f32.mrf.mxu1  ;;  %v2170_v6 = vpop.f32.mrf.mxu0 }
 0x9d6   : > { %2344 = vst [vmem:[%s3827_s24 + $0x50] sm:$0xff] %v2114_v28  ;;  %2346 = vst [vmem:[%s3827_s24 + $0x60] sm:$0xff] %v2167_v5  ;;  %v2118_v30 = vadd.f32 %v2117_v29, %v1751_v16  ;;  %v2171_v31 = vadd.f32 %v2170_v6, %v1759_v17 }
 0x9d7   : > { %v2119_v32 = vpop.f32.mrf.mxu1  ;;  %v2172_v11 = vpop.f32.mrf.mxu0 }
 0x9d8   : > { %2352 = vst [vmem:[%s3827_s24 + $0x90] sm:$0xff] %v2118_v30  ;;  %2354 = vst [vmem:[%s3827_s24 + $0xa0] sm:$0xff] %v2171_v31  ;;  %v2120_v35 = vadd.f32 %v2119_v32, %v1755_v18  ;;  %v2173_v37 = vadd.f32 %v2172_v11, %v1763_v19 }
 0x9d9   : > { %v2121_v38 = vpop.f32.mrf.mxu1  ;;  %v2174_v40 = vpop.f32.mrf.mxu0 }
 0x9da   : > { %2353 = vst [vmem:[%s3827_s24 + $0x98] sm:$0xff] %v2120_v35  ;;  %2355 = vst [vmem:[%s3827_s24 + $0xa8] sm:$0xff] %v2173_v37  ;;  %v2122_v41 = vadd.f32 %v2121_v38, %v1751_v16  ;;  %v2175_v42 = vadd.f32 %v2174_v40, %v1759_v17 }
 0x9db   : > { %v2123_v7 = vpop.f32.mrf.mxu1  ;;  %v2176_v43 = vpop.f32.mrf.mxu0 }
 0x9dc   : > { %2361 = vst [vmem:[%s3827_s24 + $0xd8] sm:$0xff] %v2122_v41  ;;  %2363 = vst [vmem:[%s3827_s24 + $0xe8] sm:$0xff] %v2175_v42  ;;  %v2124_v44 = vadd.f32 %v2123_v7, %v1755_v18  ;;  %v2177_v45 = vadd.f32 %v2176_v43, %v1763_v19 }
 0x9de   : > { %2362 = vst [vmem:[%s3827_s24 + $0xe0] sm:$0xff] %v2124_v44  ;;  %2364 = vst [vmem:[%s3827_s24 + $0xf0] sm:$0xff] %v2177_v45 }
 0x9e5   : > { %v2213_v54 = vpop.f32.mrf.mxu1  ;;  %v2266_v57 = vpop.f32.mrf.mxu0 }
 0x9e6   : > { %v2214_v58 = vadd.f32 %v2213_v54, %v1767_v50  ;;  %v2267_v59 = vadd.f32 %v2266_v57, %v1775_v51 }
 0x9e7   : > { %v2215_v62 = vpop.f32.mrf.mxu1  ;;  %v2268_v63 = vpop.f32.mrf.mxu0 }
 0x9e8   : > { %2338 = vst [vmem:[%s3827_s24 + $0x20] sm:$0xff] %v2214_v58  ;;  %2340 = vst [vmem:[%s3827_s24 + $0x30] sm:$0xff] %v2267_v59  ;;  %v2216_v33 = vadd.f32 %v2215_v62, %v1771_v52  ;;  %v2269_v1 = vadd.f32 %v2268_v63, %v1779_v53 }
 0x9e9   : > { %v2217_v2 = vpop.f32.mrf.mxu1  ;;  %v2270_v4 = vpop.f32.mrf.mxu0 }
 0x9ea   : > { %2339 = vst [vmem:[%s3827_s24 + $0x28] sm:$0xff] %v2216_v33  ;;  %2341 = vst [vmem:[%s3827_s24 + $0x38] sm:$0xff] %v2269_v1  ;;  %v2218_v8 = vadd.f32 %v2217_v2, %v1767_v50  ;;  %v2271_v10 = vadd.f32 %v2270_v4, %v1775_v51 }
 0x9eb   : > { %v2219_v12 = vpop.f32.mrf.mxu1  ;;  %v2272_v13 = vpop.f32.mrf.mxu0 }
 0x9ec   : > { %2347 = vst [vmem:[%s3827_s24 + $0x68] sm:$0xff] %v2218_v8  ;;  %2349 = vst [vmem:[%s3827_s24 + $0x78] sm:$0xff] %v2271_v10  ;;  %v2220_v60 = vadd.f32 %v2219_v12, %v1771_v52  ;;  %v2273_v14 = vadd.f32 %v2272_v13, %v1779_v53 }
 0x9ed   : > { %v2223_v9 = vpop.f32.mrf.mxu1  ;;  %v2276_v15 = vpop.f32.mrf.mxu0 }
 0x9ee   : > { %2348 = vst [vmem:[%s3827_s24 + $0x70] sm:$0xff] %v2220_v60  ;;  %2350 = vst [vmem:[%s3827_s24 + $0x80] sm:$0xff] %v2273_v14  ;;  %v2224_v55 = vadd.f32 %v2223_v9, %v1767_v50  ;;  %v2277_v61 = vadd.f32 %v2276_v15, %v1775_v51 }
 0x9ef   : > { %v2225_v16 = vpop.f32.mrf.mxu1  ;;  %v2278_v17 = vpop.f32.mrf.mxu0 }
 0x9f0   : > { %2356 = vst [vmem:[%s3827_s24 + $0xb0] sm:$0xff] %v2224_v55  ;;  %2358 = vst [vmem:[%s3827_s24 + $0xc0] sm:$0xff] %v2277_v61  ;;  %v2226_v18 = vadd.f32 %v2225_v16, %v1771_v52  ;;  %v2279_v19 = vadd.f32 %v2278_v17, %v1779_v53 }
 0x9f1   : > { %v2227_v36 = vpop.f32.mrf.mxu1  ;;  %v2280_v56 = vpop.f32.mrf.mxu0 }
 0x9f2   : > { %2357 = vst [vmem:[%s3827_s24 + $0xb8] sm:$0xff] %v2226_v18  ;;  %2359 = vst [vmem:[%s3827_s24 + $0xc8] sm:$0xff] %v2279_v19  ;;  %v2228_v20 = vadd.f32 %v2227_v36, %v1767_v50  ;;  %v2281_v39 = vadd.f32 %v2280_v56, %v1775_v51 }
 0x9f3   : > { %v2229_v21 = vpop.f32.mrf.mxu1  ;;  %v2282_v22 = vpop.f32.mrf.mxu0 }
 0x9f4   : > { %2365 = vst [vmem:[%s3827_s24 + $0xf8] sm:$0xff] %v2228_v20  ;;  %2367 = vst [vmem:[%s3827_s24 + $0x108] sm:$0xff] %v2281_v39  ;;  %v2230_v34 = vadd.f32 %v2229_v21, %v1771_v52  ;;  %v2283_v23 = vadd.f32 %v2282_v22, %v1779_v53 }
 0x9f6   : > { %2366 = vst [vmem:[%s3827_s24 + $0x100] sm:$0xff] %v2230_v34  ;;  %2368 = vst [vmem:[%s3827_s24 + $0x110] sm:$0xff] %v2283_v23 }
 0x9fd   : > { %v2831_v25 = vpop.f32.mrf.mxu1 }
 0x9fe   : > { %v2328_v26 = vadd.f32 %v2831_v25, %v2594_v24 }
 0x9ff   : > { %v2319_v27 = vpop.f32.mrf.mxu1 }
 0xa00   : > { %2360 = vst [vmem:[%s3827_s24 + $0xd0] sm:$0xff] %v2328_v26  ;;  %v2320_v3 = vadd.f32 %v2594_v24, %v2319_v27 }
 0xa01   : > { %v2832_v0 = vpop.f32.mrf.mxu1 }
 0xa02   : > { %2342 = vst [vmem:[%s3827_s24 + $0x40] sm:$0xff] %v2320_v3  ;;  %v2331_v28 = vadd.f32 %v2832_v0, %v2594_v24 }
 0xa03   : > { %v2322_v5 = vpop.f32.mrf.mxu1 }
 0xa04   : > { %2369 = vst [vmem:[%s3827_s24 + $0x118] sm:$0xff] %v2331_v28  ;;  %v2323_v29 = vadd.f32 %v2594_v24, %v2322_v5 }
 0xa06   : > { %2351 = vst [vmem:[%s3827_s24 + $0x88] sm:$0xff] %v2323_v29 }
 0xa07 PF: > { %s25_s23 = sadd.s32 1, %s3155_s23   ;;  %s3903_s21 = smov %s3151_s22 }
 0xa08   : > { %p22_p2 = scmp.ge.s32.totalorder %s25_s23, 4   ;;  %s3904_s22 = smov %s3906_s29 }
 0xa0a   :  { %24 = sbr.rel (!%p22_p2) target bundleno = 4 (0x4), region = 128 }
 0xa0f   :  { %2402 = vsyncpa [#allocation5], 1 }
 0xa10   :  { %2404 = vsyncpa [#allocation5 + $0x1], 1 }
 0xa11   :  { %2405 = vsyncpa [#allocation7], 1 }
 0xa12   :  { %2406 = vsyncpa [#allocation10], 1 }

</bundles_post_ra>
